<compile_context>
chip_gen: v5e
topology: v5e:2x2
jax: 0.10.0
libtpu: 0.0.40
codegen_flags: <defaults>
</compile_context>

<pallas_src>
import functools

import jax
import jax.numpy as jnp
from jax.experimental import pallas as pl


def _round_up(x, m):
    return (x + m - 1) // m * m


# ----------------------------------------------------------------------------
# Fused kernel: all RNN layers (wavefront) + tanh + Linear head, one call.
#
# Ref layout (all full-array VMEM blocks, gridless):
#   refs[0]                      x      : (B, T*F)    batch-first, lane-dense
#   refs[1]                      w_ih0  : (F, Up)     layer-0 input weight (pre-T, U-padded)
#   refs[2]                      w_hh0  : (Up, Up)    layer-0 recurrent weight
#   refs[3]                      b0     : (1, Up)     layer-0 fused bias (b_ih + b_hh)
#   refs[4 + 2*(l-1) + 0]        w_stk  : (2*Up, Up)  layer-l>=1 stacked [W_ih; W_hh]
#   refs[4 + 2*(l-1) + 1]        b_l    : (1, Up)     layer-l fused bias
#   refs[4 + 2*(L-1)]            w_head : (Up, Up)    head weight (pre-T, padded)
#   refs[5 + 2*(L-1)]            b_head : (1, Up)     head bias (padded)
#   refs[6 + 2*(L-1)]            out    : (B, T*Up)   lane-dense, 128-aligned blocks
# ----------------------------------------------------------------------------
def fused_expert_rnn_kernel(*refs, seqlen, batch, units_pad, num_features,
                            n_layers):
    T, B, Up, F, L = seqlen, batch, units_pad, num_features, n_layers
    f32 = jnp.float32

    x_ref = refs[0]
    w_ih0_ref, w_hh0_ref, b0_ref = refs[1], refs[2], refs[3]
    upper_refs = refs[4:4 + 2 * (L - 1)]
    w_head_ref = refs[4 + 2 * (L - 1)]
    b_head_ref = refs[5 + 2 * (L - 1)]
    out_ref = refs[6 + 2 * (L - 1)]

    x = x_ref[...].astype(f32)                                   # (B, T*F)
    w_ih0 = w_ih0_ref[...].astype(f32)                           # (F, Up)
    w_hh0 = w_hh0_ref[...].astype(f32)                           # (Up, Up)
    b0 = b0_ref[...].astype(f32)                                 # (1, Up)
    w_stk = [None] + [upper_refs[2 * i][...].astype(f32) for i in range(L - 1)]
    b_up = [None] + [upper_refs[2 * i + 1][...].astype(f32) for i in range(L - 1)]

    # Hoisted layer-0 input projections: independent of the recurrence, so the
    # scheduler overlaps them with the serial wavefront below.
    proj0 = [
        jnp.dot(x[:, t * F:(t + 1) * F], w_ih0, preferred_element_type=f32) + b0
        for t in range(T)
    ]                                                            # T x (B, Up)

    # Wavefront over (layer, time): h[l] holds layer l's hidden state at its
    # current time index.  Reads use the previous step's values (h), writes go
    # to nh, so all layers active within one step are independent.
    h = [jnp.zeros((B, Up), f32) for _ in range(L)]
    top = [None] * T                                             # last layer's output per t
    for s in range(T + L - 1):
        nh = list(h)
        for l in range(L):
            t = s - l
            if 0 <= t < T:
                if l == 0:
                    pre = proj0[t] + jnp.dot(
                        h[0], w_hh0, preferred_element_type=f32)
                else:
                    # Fused input+recurrent GEMM: rows [0, Up) of w_stk hold
                    # W_ih (input from layer l-1), rows [Up, 2*Up) hold W_hh.
                    lhs = jnp.concatenate([h[l - 1], h[l]], axis=1)  # (B, 2*Up)
                    pre = jnp.dot(
                        lhs, w_stk[l], preferred_element_type=f32) + b_up[l]
                nh[l] = jnp.tanh(pre)
                if l == L - 1:
                    top[t] = nh[l]
        h = nh

    # Head: tanh + Linear per timestep (independent GEMMs, off the serial
    # chain), then one lane-concat at 128-aligned offsets and a single
    # whole-block, lane-dense store.
    w_head = w_head_ref[...].astype(f32)                         # (Up, Up)
    b_head = b_head_ref[...].astype(f32)                         # (1, Up)
    ys = [
        jnp.dot(jnp.tanh(top[t]), w_head, preferred_element_type=f32) + b_head
        for t in range(T)
    ]                                                            # T x (B, Up)
    out_ref[...] = jnp.concatenate(ys, axis=1).astype(out_ref.dtype)


def _full_spec(shape):
    """Whole-array VMEM block (gridless call -> zero-arg index_map)."""
    return pl.BlockSpec(shape, lambda: (0,) * len(shape))


# ----------------------------------------------------------------------------
# Forward: matches Expert_RNN.forward (inference mode), batch_first API.
# ----------------------------------------------------------------------------
@functools.partial(jax.jit, static_argnames=("units",))
def expert_rnn_forward(x_btf, padded, *, units):
    B, T, F = x_btf.shape
    U = units
    Up = padded["w_hh0"].shape[0]
    L = 1 + len(padded["upper"])

    # Free contiguous metadata reshape (no transpose, no extra HBM pass on x).
    x2 = x_btf.reshape(B, T * F)

    inputs = [x2, padded["w_ih0"], padded["w_hh0"], padded["b0"]]
    for w_stk, b in padded["upper"]:
        inputs += [w_stk, b]
    inputs += [padded["w_head"], padded["b_head"]]

    kernel = functools.partial(
        fused_expert_rnn_kernel,
        seqlen=T, batch=B, units_pad=Up, num_features=F, n_layers=L,
    )

    y = pl.pallas_call(
        kernel,
        out_shape=jax.ShapeDtypeStruct((B, T * Up), x_btf.dtype),
        in_specs=[_full_spec(a.shape) for a in inputs],
        out_specs=_full_spec((B, T * Up)),
    )(*inputs)

    # (B, T*Up) -> (B, T, Up) is a free reshape; slicing off the U->128 lane
    # padding is one tiny XLA slice.
    return y.reshape(B, T, Up)[:, :, :U]


# ----------------------------------------------------------------------------
# One-time packing of logical weights into TPU-tile-friendly operands.
# Zero padding of U -> Up is exact: padded hidden columns stay 0 through tanh
# and contribute nothing downstream.
# ----------------------------------------------------------------------------
def pad_params(params):
    layers = params["layers"]
    U = layers[0]["w_hh_t"].shape[0]
    Up = _round_up(U, 128)
    f32 = jnp.float32

    lp0 = layers[0]
    F = lp0["w_ih_t"].shape[0]
    w_ih0 = jnp.zeros((F, Up), f32).at[:, :U].set(lp0["w_ih_t"])
    w_hh0 = jnp.zeros((Up, Up), f32).at[:U, :U].set(lp0["w_hh_t"])
    b0 = jnp.zeros((1, Up), f32).at[:, :U].set(lp0["b"])

    upper = []
    for lp in layers[1:]:
        w_stk = (
            jnp.zeros((2 * Up, Up), f32)
            .at[:U, :U].set(lp["w_ih_t"])             # input from layer below
            .at[Up:Up + U, :U].set(lp["w_hh_t"])      # recurrent
        )
        b = jnp.zeros((1, Up), f32).at[:, :U].set(lp["b"])
        upper.append((w_stk, b))

    w_head = jnp.zeros((Up, Up), f32).at[:U, :U].set(params["w_hidden_t"])
    b_head = jnp.zeros((1, Up), f32).at[:, :U].set(params["b_hidden"])

    return {"w_ih0": w_ih0, "w_hh0": w_hh0, "b0": b0, "upper": upper,
            "w_head": w_head, "b_head": b_head}


# ----------------------------------------------------------------------------
# Parameter construction (deterministic, PyTorch-style uniform(-1/sqrt(U), 1/sqrt(U)))
# ----------------------------------------------------------------------------
def init_params(key, units, num_features, n_layers):
    bound = 1.0 / jnp.sqrt(jnp.float32(units))
    params = {"layers": []}
    for layer in range(n_layers):
        f_in = num_features if layer == 0 else units
        key, k1, k2, k3, k4 = jax.random.split(key, 5)
        w_ih = jax.random.uniform(k1, (units, f_in), jnp.float32, -bound, bound)
        w_hh = jax.random.uniform(k2, (units, units), jnp.float32, -bound, bound)
        b_ih = jax.random.uniform(k3, (units,), jnp.float32, -bound, bound)
        b_hh = jax.random.uniform(k4, (units,), jnp.float32, -bound, bound)
        params["layers"].append(
            {
                "w_ih_t": w_ih.T,                       # (F_in, U) for x @ W^T
                "w_hh_t": w_hh.T,                       # (U, U)
                "b": (b_ih + b_hh).reshape(1, units),   # fused bias
            }
        )
    key, k5, k6 = jax.random.split(key, 3)
    w_hid = jax.random.uniform(k5, (units, units), jnp.float32, -bound, bound)
    b_hid = jax.random.uniform(k6, (units,), jnp.float32, -bound, bound)
    params["w_hidden_t"] = w_hid.T                       # (U, U)
    params["b_hidden"] = b_hid.reshape(1, units)
    return params


# ----------------------------------------------------------------------------
# Pure-JAX reference (same math) for a correctness cross-check.
# ----------------------------------------------------------------------------
def expert_rnn_reference(x_btf, params):
    x = x_btf.astype(jnp.float32)                        # (B, T, F)
    B, T, _ = x.shape
    h_seq = x
    for lp in params["layers"]:
        U = lp["w_hh_t"].shape[0]
        h = jnp.zeros((B, U), jnp.float32)
        outs = []
        for t in range(T):
            h = jnp.tanh(h_seq[:, t, :] @ lp["w_ih_t"] + h @ lp["w_hh_t"] + lp["b"])
            outs.append(h)
        h_seq = jnp.stack(outs, axis=1)                  # (B, T, U)
    return jnp.tanh(h_seq) @ params["w_hidden_t"] + params["b_hidden"]


if __name__ == "__main__":
    # Small shapes consistent with the module's forward:
    batch, seqlen, num_features, units, n_layers = 2, 8, 32, 32, 2

    key = jax.random.PRNGKey(0)
    key, xk = jax.random.split(key)
    x = jax.random.normal(xk, (batch, seqlen, num_features), jnp.float32)

    params = init_params(key, units, num_features, n_layers)
    padded = pad_params(params)

    out = expert_rnn_forward(x, padded, units=units)
    jax.block_until_ready(out)

    assert out.shape == (batch, seqlen, units)
    assert bool(jnp.all(jnp.isfinite(out)))

    ref = expert_rnn_reference(x, params)
    max_err = float(jnp.max(jnp.abs(out - ref)))
    assert jnp.allclose(out, ref, rtol=2e-2, atol=2e-2), max_err

    print("KERNEL_OK")
</pallas_src>

<mosaic_0001>
module attributes {stable_mosaic.version = 11 : i64} {
  func.func @fused_expert_rnn_kernel(%arg0: memref<2x256xf32, #tpu.memory_space<vmem>>, %arg1: memref<32x128xf32, #tpu.memory_space<vmem>>, %arg2: memref<128x128xf32, #tpu.memory_space<vmem>>, %arg3: memref<1x128xf32, #tpu.memory_space<vmem>>, %arg4: memref<256x128xf32, #tpu.memory_space<vmem>>, %arg5: memref<1x128xf32, #tpu.memory_space<vmem>>, %arg6: memref<128x128xf32, #tpu.memory_space<vmem>>, %arg7: memref<1x128xf32, #tpu.memory_space<vmem>>, %arg8: memref<2x1024xf32, #tpu.memory_space<vmem>>) attributes {dimension_semantics = [], scalar_prefetch = 0 : i64, scratch_operands = 0 : i64, tpu.core_type = #tpu.core_type<tc>} {
    %c0 = arith.constant 0 : index
    %c0_0 = arith.constant 0 : index
    %0 = vector.load %arg0[%c0, %c0_0] : memref<2x256xf32, #tpu.memory_space<vmem>>, vector<2x256xf32>
    %c0_1 = arith.constant 0 : index
    %c0_2 = arith.constant 0 : index
    %1 = vector.load %arg1[%c0_1, %c0_2] : memref<32x128xf32, #tpu.memory_space<vmem>>, vector<32x128xf32>
    %c0_3 = arith.constant 0 : index
    %c0_4 = arith.constant 0 : index
    %2 = vector.load %arg2[%c0_3, %c0_4] : memref<128x128xf32, #tpu.memory_space<vmem>>, vector<128x128xf32>
    %c0_5 = arith.constant 0 : index
    %c0_6 = arith.constant 0 : index
    %3 = vector.load %arg3[%c0_5, %c0_6] : memref<1x128xf32, #tpu.memory_space<vmem>>, vector<1x128xf32>
    %c0_7 = arith.constant 0 : index
    %c0_8 = arith.constant 0 : index
    %4 = vector.load %arg4[%c0_7, %c0_8] : memref<256x128xf32, #tpu.memory_space<vmem>>, vector<256x128xf32>
    %c0_9 = arith.constant 0 : index
    %c0_10 = arith.constant 0 : index
    %5 = vector.load %arg5[%c0_9, %c0_10] : memref<1x128xf32, #tpu.memory_space<vmem>>, vector<1x128xf32>
    %6 = vector.extract_strided_slice %0 {offsets = [0, 0], sizes = [2, 32], strides = [1, 1]} : vector<2x256xf32> to vector<2x32xf32>
    %cst = arith.constant dense<0.000000e+00> : vector<2x128xf32>
    %7 = tpu.matmul %6, %1, %cst {dimension_numbers = #tpu.dot_dimension_numbers<[1], [0], [0], [1], [0, 0, 1, 1], [], []>} : vector<2x32xf32>, vector<32x128xf32>, vector<2x128xf32> -> vector<2x128xf32>
    %8 = vector.broadcast %3 : vector<1x128xf32> to vector<2x128xf32>
    %9 = arith.addf %7, %8 : vector<2x128xf32>
    %10 = vector.extract_strided_slice %0 {offsets = [0, 32], sizes = [2, 32], strides = [1, 1]} : vector<2x256xf32> to vector<2x32xf32>
    %cst_11 = arith.constant dense<0.000000e+00> : vector<2x128xf32>
    %11 = tpu.matmul %10, %1, %cst_11 {dimension_numbers = #tpu.dot_dimension_numbers<[1], [0], [0], [1], [0, 0, 1, 1], [], []>} : vector<2x32xf32>, vector<32x128xf32>, vector<2x128xf32> -> vector<2x128xf32>
    %12 = vector.broadcast %3 : vector<1x128xf32> to vector<2x128xf32>
    %13 = arith.addf %11, %12 : vector<2x128xf32>
    %14 = vector.extract_strided_slice %0 {offsets = [0, 64], sizes = [2, 32], strides = [1, 1]} : vector<2x256xf32> to vector<2x32xf32>
    %cst_12 = arith.constant dense<0.000000e+00> : vector<2x128xf32>
    %15 = tpu.matmul %14, %1, %cst_12 {dimension_numbers = #tpu.dot_dimension_numbers<[1], [0], [0], [1], [0, 0, 1, 1], [], []>} : vector<2x32xf32>, vector<32x128xf32>, vector<2x128xf32> -> vector<2x128xf32>
    %16 = vector.broadcast %3 : vector<1x128xf32> to vector<2x128xf32>
    %17 = arith.addf %15, %16 : vector<2x128xf32>
    %18 = vector.extract_strided_slice %0 {offsets = [0, 96], sizes = [2, 32], strides = [1, 1]} : vector<2x256xf32> to vector<2x32xf32>
    %cst_13 = arith.constant dense<0.000000e+00> : vector<2x128xf32>
    %19 = tpu.matmul %18, %1, %cst_13 {dimension_numbers = #tpu.dot_dimension_numbers<[1], [0], [0], [1], [0, 0, 1, 1], [], []>} : vector<2x32xf32>, vector<32x128xf32>, vector<2x128xf32> -> vector<2x128xf32>
    %20 = vector.broadcast %3 : vector<1x128xf32> to vector<2x128xf32>
    %21 = arith.addf %19, %20 : vector<2x128xf32>
    %22 = vector.extract_strided_slice %0 {offsets = [0, 128], sizes = [2, 32], strides = [1, 1]} : vector<2x256xf32> to vector<2x32xf32>
    %cst_14 = arith.constant dense<0.000000e+00> : vector<2x128xf32>
    %23 = tpu.matmul %22, %1, %cst_14 {dimension_numbers = #tpu.dot_dimension_numbers<[1], [0], [0], [1], [0, 0, 1, 1], [], []>} : vector<2x32xf32>, vector<32x128xf32>, vector<2x128xf32> -> vector<2x128xf32>
    %24 = vector.broadcast %3 : vector<1x128xf32> to vector<2x128xf32>
    %25 = arith.addf %23, %24 : vector<2x128xf32>
    %26 = vector.extract_strided_slice %0 {offsets = [0, 160], sizes = [2, 32], strides = [1, 1]} : vector<2x256xf32> to vector<2x32xf32>
    %cst_15 = arith.constant dense<0.000000e+00> : vector<2x128xf32>
    %27 = tpu.matmul %26, %1, %cst_15 {dimension_numbers = #tpu.dot_dimension_numbers<[1], [0], [0], [1], [0, 0, 1, 1], [], []>} : vector<2x32xf32>, vector<32x128xf32>, vector<2x128xf32> -> vector<2x128xf32>
    %28 = vector.broadcast %3 : vector<1x128xf32> to vector<2x128xf32>
    %29 = arith.addf %27, %28 : vector<2x128xf32>
    %30 = vector.extract_strided_slice %0 {offsets = [0, 192], sizes = [2, 32], strides = [1, 1]} : vector<2x256xf32> to vector<2x32xf32>
    %cst_16 = arith.constant dense<0.000000e+00> : vector<2x128xf32>
    %31 = tpu.matmul %30, %1, %cst_16 {dimension_numbers = #tpu.dot_dimension_numbers<[1], [0], [0], [1], [0, 0, 1, 1], [], []>} : vector<2x32xf32>, vector<32x128xf32>, vector<2x128xf32> -> vector<2x128xf32>
    %32 = vector.broadcast %3 : vector<1x128xf32> to vector<2x128xf32>
    %33 = arith.addf %31, %32 : vector<2x128xf32>
    %34 = vector.extract_strided_slice %0 {offsets = [0, 224], sizes = [2, 32], strides = [1, 1]} : vector<2x256xf32> to vector<2x32xf32>
    %cst_17 = arith.constant dense<0.000000e+00> : vector<2x128xf32>
    %35 = tpu.matmul %34, %1, %cst_17 {dimension_numbers = #tpu.dot_dimension_numbers<[1], [0], [0], [1], [0, 0, 1, 1], [], []>} : vector<2x32xf32>, vector<32x128xf32>, vector<2x128xf32> -> vector<2x128xf32>
    %36 = vector.broadcast %3 : vector<1x128xf32> to vector<2x128xf32>
    %37 = arith.addf %35, %36 : vector<2x128xf32>
    %cst_18 = arith.constant 0.000000e+00 : f32
    %38 = vector.broadcast %cst_18 : f32 to vector<2x128xf32>
    %cst_19 = arith.constant 0.000000e+00 : f32
    %39 = vector.broadcast %cst_19 : f32 to vector<2x128xf32>
    %cst_20 = arith.constant dense<0.000000e+00> : vector<2x128xf32>
    %40 = tpu.matmul %38, %2, %cst_20 {dimension_numbers = #tpu.dot_dimension_numbers<[1], [0], [0], [1], [0, 0, 1, 1], [], []>} : vector<2x128xf32>, vector<128x128xf32>, vector<2x128xf32> -> vector<2x128xf32>
    %41 = arith.addf %9, %40 : vector<2x128xf32>
    %42 = math.tanh %41 : vector<2x128xf32>
    %cst_21 = arith.constant dense<0.000000e+00> : vector<2x128xf32>
    %43 = tpu.matmul %42, %2, %cst_21 {dimension_numbers = #tpu.dot_dimension_numbers<[1], [0], [0], [1], [0, 0, 1, 1], [], []>} : vector<2x128xf32>, vector<128x128xf32>, vector<2x128xf32> -> vector<2x128xf32>
    %44 = arith.addf %13, %43 : vector<2x128xf32>
    %45 = math.tanh %44 : vector<2x128xf32>
    %46 = tpu.concatenate %42, %39 in 1 : vector<2x128xf32>, vector<2x128xf32> -> vector<2x256xf32>
    %cst_22 = arith.constant dense<0.000000e+00> : vector<2x128xf32>
    %47 = tpu.matmul %46, %4, %cst_22 {dimension_numbers = #tpu.dot_dimension_numbers<[1], [0], [0], [1], [0, 0, 1, 1], [], []>} : vector<2x256xf32>, vector<256x128xf32>, vector<2x128xf32> -> vector<2x128xf32>
    %48 = vector.broadcast %5 : vector<1x128xf32> to vector<2x128xf32>
    %49 = arith.addf %47, %48 : vector<2x128xf32>
    %50 = math.tanh %49 : vector<2x128xf32>
    %cst_23 = arith.constant dense<0.000000e+00> : vector<2x128xf32>
    %51 = tpu.matmul %45, %2, %cst_23 {dimension_numbers = #tpu.dot_dimension_numbers<[1], [0], [0], [1], [0, 0, 1, 1], [], []>} : vector<2x128xf32>, vector<128x128xf32>, vector<2x128xf32> -> vector<2x128xf32>
    %52 = arith.addf %17, %51 : vector<2x128xf32>
    %53 = math.tanh %52 : vector<2x128xf32>
    %54 = tpu.concatenate %45, %50 in 1 : vector<2x128xf32>, vector<2x128xf32> -> vector<2x256xf32>
    %cst_24 = arith.constant dense<0.000000e+00> : vector<2x128xf32>
    %55 = tpu.matmul %54, %4, %cst_24 {dimension_numbers = #tpu.dot_dimension_numbers<[1], [0], [0], [1], [0, 0, 1, 1], [], []>} : vector<2x256xf32>, vector<256x128xf32>, vector<2x128xf32> -> vector<2x128xf32>
    %56 = vector.broadcast %5 : vector<1x128xf32> to vector<2x128xf32>
    %57 = arith.addf %55, %56 : vector<2x128xf32>
    %58 = math.tanh %57 : vector<2x128xf32>
    %cst_25 = arith.constant dense<0.000000e+00> : vector<2x128xf32>
    %59 = tpu.matmul %53, %2, %cst_25 {dimension_numbers = #tpu.dot_dimension_numbers<[1], [0], [0], [1], [0, 0, 1, 1], [], []>} : vector<2x128xf32>, vector<128x128xf32>, vector<2x128xf32> -> vector<2x128xf32>
    %60 = arith.addf %21, %59 : vector<2x128xf32>
    %61 = math.tanh %60 : vector<2x128xf32>
    %62 = tpu.concatenate %53, %58 in 1 : vector<2x128xf32>, vector<2x128xf32> -> vector<2x256xf32>
    %cst_26 = arith.constant dense<0.000000e+00> : vector<2x128xf32>
    %63 = tpu.matmul %62, %4, %cst_26 {dimension_numbers = #tpu.dot_dimension_numbers<[1], [0], [0], [1], [0, 0, 1, 1], [], []>} : vector<2x256xf32>, vector<256x128xf32>, vector<2x128xf32> -> vector<2x128xf32>
    %64 = vector.broadcast %5 : vector<1x128xf32> to vector<2x128xf32>
    %65 = arith.addf %63, %64 : vector<2x128xf32>
    %66 = math.tanh %65 : vector<2x128xf32>
    %cst_27 = arith.constant dense<0.000000e+00> : vector<2x128xf32>
    %67 = tpu.matmul %61, %2, %cst_27 {dimension_numbers = #tpu.dot_dimension_numbers<[1], [0], [0], [1], [0, 0, 1, 1], [], []>} : vector<2x128xf32>, vector<128x128xf32>, vector<2x128xf32> -> vector<2x128xf32>
    %68 = arith.addf %25, %67 : vector<2x128xf32>
    %69 = math.tanh %68 : vector<2x128xf32>
    %70 = tpu.concatenate %61, %66 in 1 : vector<2x128xf32>, vector<2x128xf32> -> vector<2x256xf32>
    %cst_28 = arith.constant dense<0.000000e+00> : vector<2x128xf32>
    %71 = tpu.matmul %70, %4, %cst_28 {dimension_numbers = #tpu.dot_dimension_numbers<[1], [0], [0], [1], [0, 0, 1, 1], [], []>} : vector<2x256xf32>, vector<256x128xf32>, vector<2x128xf32> -> vector<2x128xf32>
    %72 = vector.broadcast %5 : vector<1x128xf32> to vector<2x128xf32>
    %73 = arith.addf %71, %72 : vector<2x128xf32>
    %74 = math.tanh %73 : vector<2x128xf32>
    %cst_29 = arith.constant dense<0.000000e+00> : vector<2x128xf32>
    %75 = tpu.matmul %69, %2, %cst_29 {dimension_numbers = #tpu.dot_dimension_numbers<[1], [0], [0], [1], [0, 0, 1, 1], [], []>} : vector<2x128xf32>, vector<128x128xf32>, vector<2x128xf32> -> vector<2x128xf32>
    %76 = arith.addf %29, %75 : vector<2x128xf32>
    %77 = math.tanh %76 : vector<2x128xf32>
    %78 = tpu.concatenate %69, %74 in 1 : vector<2x128xf32>, vector<2x128xf32> -> vector<2x256xf32>
    %cst_30 = arith.constant dense<0.000000e+00> : vector<2x128xf32>
    %79 = tpu.matmul %78, %4, %cst_30 {dimension_numbers = #tpu.dot_dimension_numbers<[1], [0], [0], [1], [0, 0, 1, 1], [], []>} : vector<2x256xf32>, vector<256x128xf32>, vector<2x128xf32> -> vector<2x128xf32>
    %80 = vector.broadcast %5 : vector<1x128xf32> to vector<2x128xf32>
    %81 = arith.addf %79, %80 : vector<2x128xf32>
    %82 = math.tanh %81 : vector<2x128xf32>
    %cst_31 = arith.constant dense<0.000000e+00> : vector<2x128xf32>
    %83 = tpu.matmul %77, %2, %cst_31 {dimension_numbers = #tpu.dot_dimension_numbers<[1], [0], [0], [1], [0, 0, 1, 1], [], []>} : vector<2x128xf32>, vector<128x128xf32>, vector<2x128xf32> -> vector<2x128xf32>
    %84 = arith.addf %33, %83 : vector<2x128xf32>
    %85 = math.tanh %84 : vector<2x128xf32>
    %86 = tpu.concatenate %77, %82 in 1 : vector<2x128xf32>, vector<2x128xf32> -> vector<2x256xf32>
    %cst_32 = arith.constant dense<0.000000e+00> : vector<2x128xf32>
    %87 = tpu.matmul %86, %4, %cst_32 {dimension_numbers = #tpu.dot_dimension_numbers<[1], [0], [0], [1], [0, 0, 1, 1], [], []>} : vector<2x256xf32>, vector<256x128xf32>, vector<2x128xf32> -> vector<2x128xf32>
    %88 = vector.broadcast %5 : vector<1x128xf32> to vector<2x128xf32>
    %89 = arith.addf %87, %88 : vector<2x128xf32>
    %90 = math.tanh %89 : vector<2x128xf32>
    %cst_33 = arith.constant dense<0.000000e+00> : vector<2x128xf32>
    %91 = tpu.matmul %85, %2, %cst_33 {dimension_numbers = #tpu.dot_dimension_numbers<[1], [0], [0], [1], [0, 0, 1, 1], [], []>} : vector<2x128xf32>, vector<128x128xf32>, vector<2x128xf32> -> vector<2x128xf32>
    %92 = arith.addf %37, %91 : vector<2x128xf32>
    %93 = math.tanh %92 : vector<2x128xf32>
    %94 = tpu.concatenate %85, %90 in 1 : vector<2x128xf32>, vector<2x128xf32> -> vector<2x256xf32>
    %cst_34 = arith.constant dense<0.000000e+00> : vector<2x128xf32>
    %95 = tpu.matmul %94, %4, %cst_34 {dimension_numbers = #tpu.dot_dimension_numbers<[1], [0], [0], [1], [0, 0, 1, 1], [], []>} : vector<2x256xf32>, vector<256x128xf32>, vector<2x128xf32> -> vector<2x128xf32>
    %96 = vector.broadcast %5 : vector<1x128xf32> to vector<2x128xf32>
    %97 = arith.addf %95, %96 : vector<2x128xf32>
    %98 = math.tanh %97 : vector<2x128xf32>
    %99 = tpu.concatenate %93, %98 in 1 : vector<2x128xf32>, vector<2x128xf32> -> vector<2x256xf32>
    %cst_35 = arith.constant dense<0.000000e+00> : vector<2x128xf32>
    %100 = tpu.matmul %99, %4, %cst_35 {dimension_numbers = #tpu.dot_dimension_numbers<[1], [0], [0], [1], [0, 0, 1, 1], [], []>} : vector<2x256xf32>, vector<256x128xf32>, vector<2x128xf32> -> vector<2x128xf32>
    %101 = vector.broadcast %5 : vector<1x128xf32> to vector<2x128xf32>
    %102 = arith.addf %100, %101 : vector<2x128xf32>
    %103 = math.tanh %102 : vector<2x128xf32>
    %c0_36 = arith.constant 0 : index
    %c0_37 = arith.constant 0 : index
    %104 = vector.load %arg6[%c0_36, %c0_37] : memref<128x128xf32, #tpu.memory_space<vmem>>, vector<128x128xf32>
    %c0_38 = arith.constant 0 : index
    %c0_39 = arith.constant 0 : index
    %105 = vector.load %arg7[%c0_38, %c0_39] : memref<1x128xf32, #tpu.memory_space<vmem>>, vector<1x128xf32>
    %106 = math.tanh %50 : vector<2x128xf32>
    %cst_40 = arith.constant dense<0.000000e+00> : vector<2x128xf32>
    %107 = tpu.matmul %106, %104, %cst_40 {dimension_numbers = #tpu.dot_dimension_numbers<[1], [0], [0], [1], [0, 0, 1, 1], [], []>} : vector<2x128xf32>, vector<128x128xf32>, vector<2x128xf32> -> vector<2x128xf32>
    %108 = vector.broadcast %105 : vector<1x128xf32> to vector<2x128xf32>
    %109 = arith.addf %107, %108 : vector<2x128xf32>
    %110 = math.tanh %58 : vector<2x128xf32>
    %cst_41 = arith.constant dense<0.000000e+00> : vector<2x128xf32>
    %111 = tpu.matmul %110, %104, %cst_41 {dimension_numbers = #tpu.dot_dimension_numbers<[1], [0], [0], [1], [0, 0, 1, 1], [], []>} : vector<2x128xf32>, vector<128x128xf32>, vector<2x128xf32> -> vector<2x128xf32>
    %112 = vector.broadcast %105 : vector<1x128xf32> to vector<2x128xf32>
    %113 = arith.addf %111, %112 : vector<2x128xf32>
    %114 = math.tanh %66 : vector<2x128xf32>
    %cst_42 = arith.constant dense<0.000000e+00> : vector<2x128xf32>
    %115 = tpu.matmul %114, %104, %cst_42 {dimension_numbers = #tpu.dot_dimension_numbers<[1], [0], [0], [1], [0, 0, 1, 1], [], []>} : vector<2x128xf32>, vector<128x128xf32>, vector<2x128xf32> -> vector<2x128xf32>
    %116 = vector.broadcast %105 : vector<1x128xf32> to vector<2x128xf32>
    %117 = arith.addf %115, %116 : vector<2x128xf32>
    %118 = math.tanh %74 : vector<2x128xf32>
    %cst_43 = arith.constant dense<0.000000e+00> : vector<2x128xf32>
    %119 = tpu.matmul %118, %104, %cst_43 {dimension_numbers = #tpu.dot_dimension_numbers<[1], [0], [0], [1], [0, 0, 1, 1], [], []>} : vector<2x128xf32>, vector<128x128xf32>, vector<2x128xf32> -> vector<2x128xf32>
    %120 = vector.broadcast %105 : vector<1x128xf32> to vector<2x128xf32>
    %121 = arith.addf %119, %120 : vector<2x128xf32>
    %122 = math.tanh %82 : vector<2x128xf32>
    %cst_44 = arith.constant dense<0.000000e+00> : vector<2x128xf32>
    %123 = tpu.matmul %122, %104, %cst_44 {dimension_numbers = #tpu.dot_dimension_numbers<[1], [0], [0], [1], [0, 0, 1, 1], [], []>} : vector<2x128xf32>, vector<128x128xf32>, vector<2x128xf32> -> vector<2x128xf32>
    %124 = vector.broadcast %105 : vector<1x128xf32> to vector<2x128xf32>
    %125 = arith.addf %123, %124 : vector<2x128xf32>
    %126 = math.tanh %90 : vector<2x128xf32>
    %cst_45 = arith.constant dense<0.000000e+00> : vector<2x128xf32>
    %127 = tpu.matmul %126, %104, %cst_45 {dimension_numbers = #tpu.dot_dimension_numbers<[1], [0], [0], [1], [0, 0, 1, 1], [], []>} : vector<2x128xf32>, vector<128x128xf32>, vector<2x128xf32> -> vector<2x128xf32>
    %128 = vector.broadcast %105 : vector<1x128xf32> to vector<2x128xf32>
    %129 = arith.addf %127, %128 : vector<2x128xf32>
    %130 = math.tanh %98 : vector<2x128xf32>
    %cst_46 = arith.constant dense<0.000000e+00> : vector<2x128xf32>
    %131 = tpu.matmul %130, %104, %cst_46 {dimension_numbers = #tpu.dot_dimension_numbers<[1], [0], [0], [1], [0, 0, 1, 1], [], []>} : vector<2x128xf32>, vector<128x128xf32>, vector<2x128xf32> -> vector<2x128xf32>
    %132 = vector.broadcast %105 : vector<1x128xf32> to vector<2x128xf32>
    %133 = arith.addf %131, %132 : vector<2x128xf32>
    %134 = math.tanh %103 : vector<2x128xf32>
    %cst_47 = arith.constant dense<0.000000e+00> : vector<2x128xf32>
    %135 = tpu.matmul %134, %104, %cst_47 {dimension_numbers = #tpu.dot_dimension_numbers<[1], [0], [0], [1], [0, 0, 1, 1], [], []>} : vector<2x128xf32>, vector<128x128xf32>, vector<2x128xf32> -> vector<2x128xf32>
    %136 = vector.broadcast %105 : vector<1x128xf32> to vector<2x128xf32>
    %137 = arith.addf %135, %136 : vector<2x128xf32>
    %138 = tpu.concatenate %109, %113, %117, %121, %125, %129, %133, %137 in 1 : vector<2x128xf32>, vector<2x128xf32>, vector<2x128xf32>, vector<2x128xf32>, vector<2x128xf32>, vector<2x128xf32>, vector<2x128xf32>, vector<2x128xf32> -> vector<2x1024xf32>
    %c0_48 = arith.constant 0 : index
    %c0_49 = arith.constant 0 : index
    %139 = vector.load %arg8[%c0_48, %c0_49] : memref<2x1024xf32, #tpu.memory_space<vmem>>, vector<2x1024xf32>
    tpu.vector_store %arg8[%c0_48, %c0_49], %138 {strides = array<i32>} : memref<2x1024xf32, #tpu.memory_space<vmem>>, vector<2x1024xf32>,
    return
  }
}

</mosaic_0001>

<bundles_post_ra>
// kernel: expert_rnn_forward.1
= control target key start
LH: loop header
LB: loop body
LE: loop exit
PB: predicated region body
PF: predicated region fallthrough
CT: control target
= control target key end

     0   :  { %13 = vsyncpa [#allocation3], 0  ;;  %s2072_s0 = inlined_call_operand.vmem [shape: f32[2,256], index: 0, kind: input, shape index: {}]   ;;  %s2073_s1 = inlined_call_operand.hbm [shape: f32[32,128], index: 1, kind: input, shape index: {}]   ;;  %s2074_s2 = inlined_call_operand.hbm [shape: f32[128,128], index: 2, kind: input, shape index: {}]   ;;  %s2075_s3 = inlined_call_operand.vmem [shape: f32[1,128], index: 3, kind: input, shape index: {}]   ;;  %s2076_s4 = inlined_call_operand.hbm [shape: f32[256,128], index: 4, kind: input, shape index: {}]   ;;  %s2077_s5 = inlined_call_operand.vmem [shape: f32[1,128], index: 5, kind: input, shape index: {}]   ;;  %s2078_s6 = inlined_call_operand.hbm [shape: f32[128,128], index: 6, kind: input, shape index: {}]   ;;  %s2079_s7 = inlined_call_operand.vmem [shape: f32[1,128], index: 7, kind: input, shape index: {}]   ;;  %s2080_s8 = inlined_call_operand.vmem [shape: f32[2,1024], index: 8, kind: output, shape index: {}]  }
   0x1   :  { %14 = vsyncpa [#allocation5], 0 }
   0x2   :  { %15 = vsyncpa [#allocation8], 0  ;;  %s35_s29 = sshll.u32 %s2074_s2, 4  ;;  %s1255_s30 = smov [#allocation4]   ;;  %s36_s29 = int_to_ptr.hbm [resolvable:$true] %s35_s29 }
   0x3   :  { %s37_s9 = sshll.u32 %s1255_s30, 4  ;;  %s22_s12 = sshll.u32 %s2073_s1, 4  ;;  %s38_s9 = int_to_ptr.vmem [resolvable:$true] %s37_s9  ;;  %s23_s12 = int_to_ptr.hbm [resolvable:$true] %s22_s12 }
   0x4   :  { %s1256_s13 = smov 128   ;;  %s1257_s14 = smov 8  }
   0x5   :  { %43 = dma.hbm_to_vmem [thread:$0]  %s36_s29, 2048, %s38_s9, [#allocation5], %s1256_s13, %s1256_s13, %s1257_s14  }
   0x6   :  { %s1258_s15 = smov [#allocation2]   ;;  %s50_s19 = sshll.u32 %s2076_s4, 4  ;;  %s51_s19 = int_to_ptr.hbm [resolvable:$true] %s50_s19 }
   0x7   :  { %s24_s16 = sshll.u32 %s1258_s15, 4  ;;  %s65_s21 = sshll.u32 %s2078_s6, 4  ;;  %s25_s16 = int_to_ptr.vmem [resolvable:$true] %s24_s16  ;;  %s66_s21 = int_to_ptr.hbm [resolvable:$true] %s65_s21 }
   0x8   :  { %30 = dma.hbm_to_vmem [thread:$0]  %s23_s12, 512, %s25_s16, [#allocation3], %s1256_s13, %s1256_s13, %s1257_s14  }
   0x9   :  { %s1259_s22 = smov [#allocation6]   ;;  %s1260_s1 = smov [#allocation7]  }
   0xa   :  { %s52_s23 = sshll.u32 %s1259_s22, 4  ;;  %s67_s24 = sshll.u32 %s1260_s1, 4  ;;  %s53_s23 = int_to_ptr.vmem [resolvable:$true] %s52_s23  ;;  %s68_s24 = int_to_ptr.vmem [resolvable:$true] %s67_s24 }
   0xb   :  { %58 = dma.hbm_to_vmem [thread:$0]  %s51_s19, 4096, %s53_s23, [#allocation5], %s1256_s13, %s1256_s13, %s1257_s14  }
   0xc   :  { %73 = dma.hbm_to_vmem [thread:$0]  %s66_s21, 2048, %s68_s24, [#allocation8], %s1256_s13, %s1256_s13, %s1257_s14  }
   0xd   :  { %1249 = dma.done.wait [#allocation3], 512  }
   0xe   :  { %1250 = vsyncadd [#allocation3], 4294966784 }
   0xf   :  { %1251 = dma.done.wait [#allocation5], 6144  }
  0x10   :  { %1252 = vsyncadd [#allocation5], 4294961152 }
  0x11   :  { %1253 = dma.done.wait [#allocation8], 2048  }
  0x12   :  { %1254 = vsyncadd [#allocation8], 4294965248  ;;  %v96_v0 = vld [vmem:[#allocation2 + $0x18] sm:$0xff]  ;;  %v95_v1 = vld [vmem:[#allocation2 + $0x10] sm:$0xff]  ;;  %vm150_vm0 = vcmask 261120   ;;  %s1262_s25 = smov 64  }
  0x13   :  { %166 = vmatpush.msra.mxu0 %v96_v0  ;;  %v1325_v2 = vld [vmem:[%s2072_s0] sm:$0xf]  ;;  %192 = vmatpush.msra.mxu1 %v96_v0  ;;  %v94_v3 = vld [vmem:[#allocation2 + $0x8] sm:$0xff]  ;;  %v93_v4 = vld [vmem:[#allocation2] sm:$0xff]  ;;  %s1261_s0 = smov 96   ;;  %s1263_s26 = smov 32  }
  0x14   :  { %174 = vst [vmem:[#allocation1] ss:$4 sm:$0xff] %v1325_v2  ;;  %218 = vmatpush.msra.mxu2 %v96_v0  ;;  %244 = vmatpush.msra.mxu3 %v96_v0  ;;  %v1332_v6 = vld [vmem:[#allocation4 + $0x78] sm:$0xff]  ;;  %v1334_v7 = vld [vmem:[#allocation4 + $0x70] sm:$0xff]  ;;  %v1337_v8 = vld [vmem:[#allocation4 + $0x68] sm:$0xff]  ;;  %v1264_v26 = vmov 0.0  }
  0x15   :  { %167 = vmatpush.msra.mxu0 %v95_v1  ;;  %193 = vmatpush.msra.mxu1 %v95_v1  ;;  %v1340_v10 = vld [vmem:[#allocation4 + $0x60] sm:$0xff]  ;;  %v1345_v11 = vld [vmem:[#allocation4 + $0x58] sm:$0xff]  ;;  %v1348_v12 = vld [vmem:[#allocation4 + $0x50] sm:$0xff]  ;;  %vm1063_vm1 = vcmask 1041408   ;;  %vm1065_vm2 = vcmask 1045508   ;;  %vm1067_vm3 = vcmask 1043456  }
  0x16   :  { %219 = vmatpush.msra.mxu2 %v95_v1  ;;  %245 = vmatpush.msra.mxu3 %v95_v1  ;;  %v1351_v13 = vld [vmem:[#allocation4 + $0x48] sm:$0xff]  ;;  %v1354_v15 = vld [vmem:[#allocation4 + $0x40] sm:$0xff]  ;;  %v1359_v16 = vld [vmem:[#allocation4 + $0x38] sm:$0xff] }
  0x17   :  { %168 = vmatpush.msra.mxu0 %v94_v3  ;;  %194 = vmatpush.msra.mxu1 %v94_v3  ;;  %v1362_v17 = vld [vmem:[#allocation4 + $0x30] sm:$0xff]  ;;  %v1365_v18 = vld [vmem:[#allocation4 + $0x28] sm:$0xff]  ;;  %v1368_v20 = vld [vmem:[#allocation4 + $0x20] sm:$0xff] }
  0x18   :  { %220 = vmatpush.msra.mxu2 %v94_v3  ;;  %246 = vmatpush.msra.mxu3 %v94_v3  ;;  %v1373_v21 = vld [vmem:[#allocation4 + $0x18] sm:$0xff]  ;;  %v1376_v22 = vld [vmem:[#allocation4 + $0x10] sm:$0xff]  ;;  %v1379_v23 = vld [vmem:[#allocation4 + $0x8] sm:$0xff] }
  0x19   :  { %169 = vmatpush.msra.mxu0 %v93_v4  ;;  %195 = vmatpush.msra.mxu1 %v93_v4  ;;  %v1382_v25 = vld [vmem:[#allocation4] sm:$0xff]  ;;  %v1408_v29 = vld [vmem:[#allocation6 + $0x78] sm:$0xff]  ;;  %v1411_v30 = vld [vmem:[#allocation6 + $0x70] sm:$0xff] }
  0x1a   :  { %221 = vmatpush.msra.mxu2 %v93_v4  ;;  %1083 = vmatmul.msk.f32.vlgmr.msra.gmra.mxu0 %vm150_vm0, %v1325_v2  ;;  %v1414_v31 = vld [vmem:[#allocation6 + $0x68] sm:$0xff]  ;;  %v1417_v32 = vld [vmem:[#allocation6 + $0x60] sm:$0xff]  ;;  %v1420_v33 = vld [vmem:[#allocation6 + $0x58] sm:$0xff] }
  0x1b   :  { %268 = vmatpush.msrb.mxu0 %v96_v0  ;;  %v175_v5 = vld.sshfl [vmem:[#allocation1] sm:$0xff pattern:$0x73625140]  ;;  %294 = vmatpush.msrb.mxu1 %v96_v0  ;;  %v1423_v34 = vld [vmem:[#allocation6 + $0x50] sm:$0xff]  ;;  %v1426_v35 = vld [vmem:[#allocation6 + $0x48] sm:$0xff] }
  0x1c   :  { %176 = vrot.lane.b32.xlu0 %v175_v5, %s1261_s0  ;;  %200 = vst [vmem:[#allocation1] ss:$4 sm:$0xff] %v1325_v2  ;;  %320 = vmatpush.msrb.mxu2 %v96_v0  ;;  %v1432_v37 = vld [vmem:[#allocation6 + $0x40] sm:$0xff]  ;;  %v1436_v38 = vld [vmem:[#allocation6 + $0x38] sm:$0xff]  ;;  %v1440_v40 = vld [vmem:[#allocation6 + $0x30] sm:$0xff] }
  0x1d   :  { %269 = vmatpush.msrb.mxu0 %v95_v1  ;;  %247 = vmatpush.msra.mxu3 %v93_v4  ;;  %v1446_v41 = vld [vmem:[#allocation6 + $0x28] sm:$0xff]  ;;  %v1453_v42 = vld [vmem:[#allocation6 + $0xf8] sm:$0xff]  ;;  %v1458_v45 = vld [vmem:[#allocation6 + $0xf0] sm:$0xff] }
  0x1e   :  { %295 = vmatpush.msrb.mxu1 %v95_v1  ;;  %321 = vmatpush.msrb.mxu2 %v95_v1  ;;  %v1463_v46 = vld [vmem:[#allocation6 + $0x20] sm:$0xff]  ;;  %v1465_v47 = vld [vmem:[#allocation6 + $0xe8] sm:$0xff]  ;;  %v1471_v48 = vld [vmem:[#allocation6 + $0x18] sm:$0xff] }
  0x1f   :  { %270 = vmatpush.msrb.mxu0 %v94_v3  ;;  %346 = vmatpush.msrb.mxu3 %v96_v0  ;;  %v1473_v49 = vld [vmem:[#allocation6 + $0xe0] sm:$0xff]  ;;  %v1479_v50 = vld [vmem:[#allocation6 + $0x10] sm:$0xff]  ;;  %v1481_v51 = vld [vmem:[#allocation6 + $0xd8] sm:$0xff] }
  0x20   :  { %296 = vmatpush.msrb.mxu1 %v94_v3  ;;  %322 = vmatpush.msrb.mxu2 %v94_v3  ;;  %v1487_v53 = vld [vmem:[#allocation6 + $0xd0] sm:$0xff]  ;;  %v1493_v54 = vld [vmem:[#allocation6 + $0x8] sm:$0xff]  ;;  %v1501_v56 = vld [vmem:[#allocation6] sm:$0xff] }
  0x21   :  { %271 = vmatpush.msrb.mxu0 %v93_v4  ;;  %347 = vmatpush.msrb.mxu3 %v95_v1  ;;  %v1495_v55 = vld [vmem:[#allocation6 + $0xc8] sm:$0xff]  ;;  %v1503_v58 = vld [vmem:[#allocation6 + $0xc0] sm:$0xff]  ;;  %v1509_v59 = vld [vmem:[#allocation6 + $0xb8] sm:$0xff] }
  0x22   :  { %297 = vmatpush.msrb.mxu1 %v93_v4  ;;  %323 = vmatpush.msrb.mxu2 %v93_v4  ;;  %v1514_v61 = vld [vmem:[#allocation6 + $0xb0] sm:$0xff]  ;;  %v1519_v62 = vld [vmem:[#allocation6 + $0xa8] sm:$0xff]  ;;  %v1526_v0 = vld [vmem:[#allocation6 + $0xa0] sm:$0xff] }
  0x23   :  { %354 = vmatpush.msra.mxu0 %v1332_v6  ;;  %v201_v9 = vld.sshfl [vmem:[#allocation1] sm:$0xff pattern:$0x73625140]  ;;  %348 = vmatpush.msrb.mxu3 %v94_v3  ;;  %v1551_v5 = vld [vmem:[#allocation6 + $0x80] sm:$0xff] }
  0x24   :  { %202 = vrot.lane.b32.xlu0 %v201_v9, %s1262_s25  ;;  %226 = vst [vmem:[#allocation1] ss:$4 sm:$0xff] %v1325_v2  ;;  %v1531_v1 = vld [vmem:[#allocation6 + $0x98] sm:$0xff] }
  0x25   :  { %355 = vmatpush.msra.mxu0 %v1334_v7  ;;  %349 = vmatpush.msrb.mxu3 %v93_v4  ;;  %v1543_v3 = vld [vmem:[%s2075_s3] ss:$0 sm:$0xff]  ;;  %v1546_v4 = vld [vmem:[#allocation6 + $0x88] sm:$0xff] }
  0x27   :  { %356 = vmatpush.msra.mxu0 %v1337_v8 }
  0x29   :  { %357 = vmatpush.msra.mxu0 %v1340_v10 }
  0x2b   :  { %358 = vmatpush.msra.mxu0 %v1345_v11  ;;  %v227_v14 = vld.sshfl [vmem:[#allocation1] sm:$0xff pattern:$0x73625140] }
  0x2c   :  { %228 = vrot.lane.b32.xlu1 %v227_v14, %s1263_s26  ;;  %252 = vst [vmem:[#allocation1] ss:$4 sm:$0xff] %v1325_v2 }
  0x2d   :  { %359 = vmatpush.msra.mxu0 %v1348_v12 }
  0x2f   :  { %360 = vmatpush.msra.mxu0 %v1351_v13 }
  0x31   :  { %361 = vmatpush.msra.mxu0 %v1354_v15 }
  0x33   :  { %362 = vmatpush.msra.mxu0 %v1359_v16  ;;  %v253_v19 = vld.sshfl [vmem:[#allocation1 + $0x8] sm:$0xff pattern:$0x73625140] }
  0x34   :  { %1087 = vmatmul.msk.f32.vlgmr.msrb.gmra.mxu0 %vm150_vm0, %v253_v19  ;;  %276 = vst [vmem:[#allocation1] ss:$4 sm:$0xff] %v1325_v2 }
  0x35   :  { %363 = vmatpush.msra.mxu0 %v1362_v17 }
  0x37   :  { %364 = vmatpush.msra.mxu0 %v1365_v18 }
  0x39   :  { %365 = vmatpush.msra.mxu0 %v1368_v20 }
  0x3b   :  { %366 = vmatpush.msra.mxu0 %v1373_v21  ;;  %v277_v24 = vld.sshfl [vmem:[#allocation1 + $0x8] sm:$0xff pattern:$0x73625140] }
  0x3c   :  { %278 = vrot.lane.b32.xlu1 %v277_v24, %s1261_s0  ;;  %302 = vst [vmem:[#allocation1] ss:$4 sm:$0xff] %v1325_v2 }
  0x3d   :  { %367 = vmatpush.msra.mxu0 %v1376_v22 }
  0x3f   :  { %368 = vmatpush.msra.mxu0 %v1379_v23 }
  0x41   :  { %369 = vmatpush.msra.mxu0 %v1382_v25 }
  0x42   :  { %370 = vmatmul.f32.vlgmr.msra.gmra.mxu0 %v1264_v26 }
  0x43   :  { %442 = vmatpush.msrb.mxu0 %v1332_v6  ;;  %v303_v27 = vld.sshfl [vmem:[#allocation1 + $0x8] sm:$0xff pattern:$0x73625140] }
  0x44   :  { %304 = vrot.lane.b32.xlu2 %v303_v27, %s1262_s25  ;;  %328 = vst [vmem:[#allocation1] ss:$4 sm:$0xff] %v1325_v2  ;;  %v1536_v2 = vld [vmem:[#allocation6 + $0x90] sm:$0xff] }
  0x45   :  { %443 = vmatpush.msrb.mxu0 %v1334_v7 }
  0x47   :  { %444 = vmatpush.msrb.mxu0 %v1337_v8 }
  0x49   :  { %445 = vmatpush.msrb.mxu0 %v1340_v10 }
  0x4b   :  { %446 = vmatpush.msrb.mxu0 %v1345_v11  ;;  %v329_v28 = vld.sshfl [vmem:[#allocation1 + $0x8] sm:$0xff pattern:$0x73625140] }
  0x4c   :  { %330 = vrot.lane.b32.xlu2 %v329_v28, %s1263_s26 }
  0x4d   :  { %447 = vmatpush.msrb.mxu0 %v1348_v12 }
  0x4f   :  { %448 = vmatpush.msrb.mxu0 %v1351_v13 }
  0x51   :  { %449 = vmatpush.msrb.mxu0 %v1354_v15 }
  0x53   :  { %450 = vmatpush.msrb.mxu0 %v1359_v16 }
  0x55   :  { %451 = vmatpush.msrb.mxu0 %v1362_v17 }
  0x57   :  { %452 = vmatpush.msrb.mxu0 %v1365_v18 }
  0x59   :  { %453 = vmatpush.msrb.mxu0 %v1368_v20 }
  0x5b   :  { %454 = vmatpush.msrb.mxu0 %v1373_v21 }
  0x5d   :  { %455 = vmatpush.msrb.mxu0 %v1376_v22 }
  0x5f   :  { %456 = vmatpush.msrb.mxu0 %v1379_v23 }
  0x61   :  { %457 = vmatpush.msrb.mxu0 %v1382_v25 }
  0x63   :  { %527 = vmatpush.msra.mxu0 %v1408_v29 }
  0x65   :  { %528 = vmatpush.msra.mxu0 %v1411_v30 }
  0x67   :  { %529 = vmatpush.msra.mxu0 %v1414_v31 }
  0x69   :  { %530 = vmatpush.msra.mxu0 %v1417_v32 }
  0x6b   :  { %531 = vmatpush.msra.mxu0 %v1420_v33 }
  0x6d   :  { %532 = vmatpush.msra.mxu0 %v1423_v34 }
  0x6f   :  { %533 = vmatpush.msra.mxu0 %v1426_v35 }
  0x71   :  { %534 = vmatpush.msra.mxu0 %v1432_v37 }
  0x73   :  { %535 = vmatpush.msra.mxu0 %v1436_v38 }
  0x75   :  { %536 = vmatpush.msra.mxu0 %v1440_v40 }
  0x77   :  { %537 = vmatpush.msra.mxu0 %v1446_v41 }
  0x79   :  { %538 = vmatpush.msra.mxu0 %v1463_v46 }
  0x7b   :  { %539 = vmatpush.msra.mxu0 %v1471_v48 }
  0x7d   :  { %540 = vmatpush.msra.mxu0 %v1479_v50 }
  0x7f   :  { %541 = vmatpush.msra.mxu0 %v1493_v54 }
  0x81   :  { %542 = vmatpush.msra.mxu0 %v1501_v56 }
  0x8e   :  { %v177_v36 = vpop.permute.xlu0 %176 }
  0x8f   :  { %1084 = vmatmul.msk.f32.vlgmr.msra.gmra.mxu1 %vm150_vm0, %v177_v36 }
  0x90   :  { %376 = vmatpush.msra.mxu1 %v1332_v6 }
  0x92   :  { %377 = vmatpush.msra.mxu1 %v1334_v7 }
  0x94   :  { %378 = vmatpush.msra.mxu1 %v1337_v8 }
  0x96   :  { %v203_v39 = vpop.permute.xlu0 %202  ;;  %379 = vmatpush.msra.mxu1 %v1340_v10 }
  0x97   :  { %1085 = vmatmul.msk.f32.vlgmr.msra.gmra.mxu2 %vm150_vm0, %v203_v39  ;;  %v171_v57 = vpop.f32.mrf.mxu0 }
  0x98   :  { %401 = vmatpush.msra.mxu2 %v1408_v29  ;;  %380 = vmatpush.msra.mxu1 %v1345_v11  ;;  %v172_v9 = vadd.f32 %v1543_v3, %v171_v57 }
  0x9a   :  { %402 = vmatpush.msra.mxu2 %v1411_v30  ;;  %381 = vmatpush.msra.mxu1 %v1348_v12 }
  0x9c   :  { %403 = vmatpush.msra.mxu2 %v1414_v31  ;;  %382 = vmatpush.msra.mxu1 %v1351_v13 }
  0x9e   :  { %v229_v43 = vpop.permute.xlu1 %228  ;;  %404 = vmatpush.msra.mxu2 %v1417_v32  ;;  %383 = vmatpush.msra.mxu1 %v1354_v15  ;;  %v305_v44 = vpop.permute.xlu2 %304 }
  0x9f   :  { %1086 = vmatmul.msk.f32.vlgmr.msra.gmra.mxu3 %vm150_vm0, %v229_v43  ;;  %1089 = vmatmul.msk.f32.vlgmr.msrb.gmra.mxu2 %vm150_vm0, %v305_v44 }
  0xa0   :  { %421 = vmatpush.msra.mxu3 %v1453_v42  ;;  %405 = vmatpush.msra.mxu2 %v1420_v33 }
  0xa1   :  { %384 = vmatpush.msra.mxu1 %v1359_v16 }
  0xa2   :  { %422 = vmatpush.msra.mxu3 %v1458_v45  ;;  %406 = vmatpush.msra.mxu2 %v1423_v34 }
  0xa3   :  { %385 = vmatpush.msra.mxu1 %v1362_v17 }
  0xa4   :  { %423 = vmatpush.msra.mxu3 %v1465_v47  ;;  %407 = vmatpush.msra.mxu2 %v1426_v35 }
  0xa5   :  { %386 = vmatpush.msra.mxu1 %v1365_v18 }
  0xa6   :  { %424 = vmatpush.msra.mxu3 %v1473_v49  ;;  %408 = vmatpush.msra.mxu2 %v1432_v37  ;;  %v331_v52 = vpop.permute.xlu2 %330 }
  0xa7   :  { %387 = vmatpush.msra.mxu1 %v1368_v20  ;;  %1090 = vmatmul.msk.f32.vlgmr.msrb.gmra.mxu3 %vm150_vm0, %v331_v52 }
  0xa8   :  { %425 = vmatpush.msra.mxu3 %v1481_v51  ;;  %409 = vmatpush.msra.mxu2 %v1436_v38 }
  0xa9   :  { %388 = vmatpush.msra.mxu1 %v1373_v21 }
  0xaa   :  { %426 = vmatpush.msra.mxu3 %v1487_v53  ;;  %410 = vmatpush.msra.mxu2 %v1440_v40 }
  0xab   :  { %389 = vmatpush.msra.mxu1 %v1376_v22 }
  0xac   :  { %427 = vmatpush.msra.mxu3 %v1495_v55  ;;  %411 = vmatpush.msra.mxu2 %v1446_v41 }
  0xad   :  { %390 = vmatpush.msra.mxu1 %v1379_v23 }
  0xae   :  { %428 = vmatpush.msra.mxu3 %v1503_v58  ;;  %412 = vmatpush.msra.mxu2 %v1463_v46  ;;  %v279_v60 = vpop.permute.xlu1 %278 }
  0xaf   :  { %1088 = vmatmul.msk.f32.vlgmr.msrb.gmra.mxu1 %vm150_vm0, %v279_v60  ;;  %v1661_v60 = vld [vmem:[%s2077_s5] ss:$0 sm:$0xff] }
  0xb0   :  { %429 = vmatpush.msra.mxu3 %v1509_v59  ;;  %413 = vmatpush.msra.mxu2 %v1471_v48 }
  0xb1   :  { %391 = vmatpush.msra.mxu1 %v1382_v25  ;;  %v1524_v63 = vpop.f32.mrf.mxu0 }
  0xb2   :  { %430 = vmatpush.msra.mxu3 %v1514_v61  ;;  %414 = vmatpush.msra.mxu2 %v1479_v50 }
  0xb3   :  { %464 = vmatpush.msrb.mxu1 %v1408_v29 }
  0xb4   :  { %431 = vmatpush.msra.mxu3 %v1519_v62  ;;  %415 = vmatpush.msra.mxu2 %v1493_v54 }
  0xb5   :  { %465 = vmatpush.msrb.mxu1 %v1411_v30 }
  0xb6   :  { %432 = vmatpush.msra.mxu3 %v1526_v0  ;;  %416 = vmatpush.msra.mxu2 %v1501_v56 }
  0xb7   :  { %466 = vmatpush.msrb.mxu1 %v1414_v31 }
  0xb8   :  { %484 = vmatpush.msrb.mxu2 %v1453_v42  ;;  %433 = vmatpush.msra.mxu3 %v1531_v1 }
  0xb9   :  { %467 = vmatpush.msrb.mxu1 %v1417_v32 }
  0xba   :  { %485 = vmatpush.msrb.mxu2 %v1458_v45  ;;  %434 = vmatpush.msra.mxu3 %v1536_v2 }
  0xbb   :  { %468 = vmatpush.msrb.mxu1 %v1420_v33 }
  0xbc   :  { %486 = vmatpush.msrb.mxu2 %v1465_v47  ;;  %435 = vmatpush.msra.mxu3 %v1546_v4 }
  0xbd   :  { %469 = vmatpush.msrb.mxu1 %v1423_v34 }
  0xbe   :  { %487 = vmatpush.msrb.mxu2 %v1473_v49  ;;  %436 = vmatpush.msra.mxu3 %v1551_v5 }
  0xbf   :  { %v371_v14 = vpop.f32.mrf.mxu0  ;;  %437 = vmatmul.f32.vlgmr.msra.gmra.mxu3 %v1264_v26  ;;  %470 = vmatpush.msrb.mxu1 %v1426_v35 }
  0xc0   :  { %v374_v19 = vadd.f32 %v371_v14, %v172_v9  ;;  %488 = vmatpush.msrb.mxu2 %v1481_v51  ;;  %505 = vmatpush.msrb.mxu3 %v1332_v6 }
  0xc1   :  { %471 = vmatpush.msrb.mxu1 %v1432_v37 }
  0xc2   :  { %1104 = vtanh.f32 %v374_v19  ;;  %489 = vmatpush.msrb.mxu2 %v1487_v53  ;;  %506 = vmatpush.msrb.mxu3 %v1334_v7 }
  0xc3   :  { %472 = vmatpush.msrb.mxu1 %v1436_v38 }
  0xc4   :  { %490 = vmatpush.msrb.mxu2 %v1495_v55  ;;  %507 = vmatpush.msrb.mxu3 %v1337_v8 }
  0xc5   :  { %473 = vmatpush.msrb.mxu1 %v1440_v40 }
  0xc6   :  { %491 = vmatpush.msrb.mxu2 %v1503_v58  ;;  %508 = vmatpush.msrb.mxu3 %v1340_v10 }
  0xc7   :  { %474 = vmatpush.msrb.mxu1 %v1446_v41 }
  0xc8   :  { %v1105_v24 = vpop.eup %1104  ;;  %492 = vmatpush.msrb.mxu2 %v1509_v59  ;;  %509 = vmatpush.msrb.mxu3 %v1345_v11 }
  0xc9   :  { %392 = vmatmul.f32.vlgmr.msra.gmra.mxu1 %v1105_v24  ;;  %417 = vmatmul.f32.vlgmr.msra.gmra.mxu2 %v1105_v24 }
  0xca   :  { %475 = vmatpush.msrb.mxu1 %v1463_v46  ;;  %493 = vmatpush.msrb.mxu2 %v1514_v61 }
  0xcb   :  { %510 = vmatpush.msrb.mxu3 %v1348_v12 }
  0xcc   :  { %476 = vmatpush.msrb.mxu1 %v1471_v48  ;;  %494 = vmatpush.msrb.mxu2 %v1519_v62 }
  0xcd   :  { %511 = vmatpush.msrb.mxu3 %v1351_v13 }
  0xce   :  { %477 = vmatpush.msrb.mxu1 %v1479_v50  ;;  %495 = vmatpush.msrb.mxu2 %v1526_v0 }
  0xcf   :  { %512 = vmatpush.msrb.mxu3 %v1354_v15 }
  0xd0   :  { %478 = vmatpush.msrb.mxu1 %v1493_v54  ;;  %496 = vmatpush.msrb.mxu2 %v1531_v1 }
  0xd1   :  { %513 = vmatpush.msrb.mxu3 %v1359_v16 }
  0xd2   :  { %479 = vmatpush.msrb.mxu1 %v1501_v56  ;;  %497 = vmatpush.msrb.mxu2 %v1536_v2 }
  0xd3   :  { %514 = vmatpush.msrb.mxu3 %v1362_v17 }
  0xd4   :  { %547 = vmatpush.msra.mxu1 %v1453_v42  ;;  %498 = vmatpush.msrb.mxu2 %v1546_v4 }
  0xd5   :  { %515 = vmatpush.msrb.mxu3 %v1365_v18 }
  0xd6   :  { %548 = vmatpush.msra.mxu1 %v1458_v45  ;;  %499 = vmatpush.msrb.mxu2 %v1551_v5 }
  0xd7   :  { %516 = vmatpush.msrb.mxu3 %v1368_v20 }
  0xd8   :  { %549 = vmatpush.msra.mxu1 %v1465_v47  ;;  %568 = vmatpush.msra.mxu2 %v1332_v6 }
  0xd9   :  { %517 = vmatpush.msrb.mxu3 %v1373_v21 }
  0xda   :  { %550 = vmatpush.msra.mxu1 %v1473_v49  ;;  %569 = vmatpush.msra.mxu2 %v1334_v7 }
  0xdb   :  { %518 = vmatpush.msrb.mxu3 %v1376_v22 }
  0xdc   :  { %551 = vmatpush.msra.mxu1 %v1481_v51  ;;  %570 = vmatpush.msra.mxu2 %v1337_v8 }
  0xdd   :  { %519 = vmatpush.msrb.mxu3 %v1379_v23 }
  0xde   :  { %552 = vmatpush.msra.mxu1 %v1487_v53  ;;  %571 = vmatpush.msra.mxu2 %v1340_v10 }
  0xdf   :  { %520 = vmatpush.msrb.mxu3 %v1382_v25 }
  0xe0   :  { %553 = vmatpush.msra.mxu1 %v1495_v55  ;;  %572 = vmatpush.msra.mxu2 %v1345_v11 }
  0xe1   :  { %590 = vmatpush.msra.mxu3 %v1408_v29 }
  0xe2   :  { %554 = vmatpush.msra.mxu1 %v1503_v58  ;;  %573 = vmatpush.msra.mxu2 %v1348_v12 }
  0xe3   :  { %591 = vmatpush.msra.mxu3 %v1411_v30 }
  0xe4   :  { %555 = vmatpush.msra.mxu1 %v1509_v59  ;;  %574 = vmatpush.msra.mxu2 %v1351_v13 }
  0xe5   :  { %592 = vmatpush.msra.mxu3 %v1414_v31 }
  0xe6   :  { %556 = vmatpush.msra.mxu1 %v1514_v61  ;;  %575 = vmatpush.msra.mxu2 %v1354_v15 }
  0xe7   :  { %593 = vmatpush.msra.mxu3 %v1417_v32 }
  0xe8   :  { %557 = vmatpush.msra.mxu1 %v1519_v62  ;;  %576 = vmatpush.msra.mxu2 %v1359_v16 }
  0xe9   :  { %594 = vmatpush.msra.mxu3 %v1420_v33 }
  0xea   :  { %558 = vmatpush.msra.mxu1 %v1526_v0  ;;  %577 = vmatpush.msra.mxu2 %v1362_v17 }
  0xeb   :  { %595 = vmatpush.msra.mxu3 %v1423_v34 }
  0xec   :  { %559 = vmatpush.msra.mxu1 %v1531_v1  ;;  %578 = vmatpush.msra.mxu2 %v1365_v18 }
  0xed   :  { %596 = vmatpush.msra.mxu3 %v1426_v35 }
  0xee   :  { %560 = vmatpush.msra.mxu1 %v1536_v2  ;;  %579 = vmatpush.msra.mxu2 %v1368_v20 }
  0xef   :  { %597 = vmatpush.msra.mxu3 %v1432_v37 }
  0xf0   :  { %561 = vmatpush.msra.mxu1 %v1546_v4  ;;  %580 = vmatpush.msra.mxu2 %v1373_v21 }
  0xf1   :  { %598 = vmatpush.msra.mxu3 %v1436_v38 }
  0xf2   :  { %562 = vmatpush.msra.mxu1 %v1551_v5  ;;  %581 = vmatpush.msra.mxu2 %v1376_v22 }
  0xf3   :  { %599 = vmatpush.msra.mxu3 %v1440_v40 }
  0xf4   :  { %582 = vmatpush.msra.mxu2 %v1379_v23 }
  0xf5   :  { %600 = vmatpush.msra.mxu3 %v1446_v41 }
  0xf6   :  { %583 = vmatpush.msra.mxu2 %v1382_v25 }
  0xf7   :  { %601 = vmatpush.msra.mxu3 %v1463_v46 }
  0xf9   :  { %602 = vmatpush.msra.mxu3 %v1471_v48 }
  0xfb   :  { %603 = vmatpush.msra.mxu3 %v1479_v50 }
  0xfd   :  { %604 = vmatpush.msra.mxu3 %v1493_v54 }
  0xff   :  { %605 = vmatpush.msra.mxu3 %v1501_v56 }
 0x10c   :  { %v197_v26 = vpop.f32.mrf.mxu1 }
 0x10d   :  { %v198_v44 = vadd.f32 %v1543_v3, %v197_v26 }
 0x11a   :  { %v1649_v28 = vpop.f32.mrf.mxu2 }
 0x122   :  { %v1647_v27 = vpop.f32.mrf.mxu3  ;;  %v1655_v43 = vpop.f32.mrf.mxu2 }
 0x12a   :  { %v1653_v39 = vpop.f32.mrf.mxu3 }
 0x12c   :  { %v1651_v36 = vpop.f32.mrf.mxu1 }
 0x12d   :  { %2081 = vst [vmem:[#allocation12_spill] sm:$0xff] %v1651_v36 }
 0x142   :  { %v438_v14 = vpop.f32.mrf.mxu3 }
 0x146   :  { %v393_v52 = vpop.f32.mrf.mxu1 }
 0x147   :  { %v396_v57 = vadd.f32 %v393_v52, %v198_v44 }
 0x149   :  { %1106 = vtanh.f32 %v396_v57 }
 0x14c   :  { %v418_v9 = vpop.f32.mrf.mxu2 }
 0x14d   :  { %v419_v19 = vadd.f32 %v1661_v60, %v418_v9 }
 0x14f   :  { %v1107_v24 = vpop.eup %1106  ;;  %v439_v36 = vadd.f32 %v438_v14, %v419_v19 }
 0x150   :  { %458 = vmatmul.f32.vlgmr.msrb.gmra.mxu0 %v1107_v24  ;;  %480 = vmatmul.f32.vlgmr.msrb.gmra.mxu1 %v1107_v24 }
 0x151   :  { %1108 = vtanh.f32 %v439_v36  ;;  %610 = vmatpush.msrb.mxu0 %v1453_v42  ;;  %631 = vmatpush.msrb.mxu1 %v1332_v6  ;;  %v224_v36 = vadd.f32 %v1543_v3, %v1649_v28 }
 0x153   :  { %611 = vmatpush.msrb.mxu0 %v1458_v45  ;;  %632 = vmatpush.msrb.mxu1 %v1334_v7 }
 0x155   :  { %612 = vmatpush.msrb.mxu0 %v1465_v47  ;;  %633 = vmatpush.msrb.mxu1 %v1337_v8 }
 0x157   :  { %v1670_v26 = vpop.eup %1108  ;;  %613 = vmatpush.msrb.mxu0 %v1473_v49  ;;  %634 = vmatpush.msrb.mxu1 %v1340_v10 }
 0x158   :  { %500 = vmatmul.f32.vlgmr.msrb.gmra.mxu2 %v1670_v26 }
 0x159   :  { %614 = vmatpush.msrb.mxu0 %v1481_v51  ;;  %653 = vmatpush.msrb.mxu2 %v1408_v29 }
 0x15a   :  { %635 = vmatpush.msrb.mxu1 %v1345_v11 }
 0x15b   :  { %615 = vmatpush.msrb.mxu0 %v1487_v53  ;;  %654 = vmatpush.msrb.mxu2 %v1411_v30 }
 0x15c   :  { %636 = vmatpush.msrb.mxu1 %v1348_v12 }
 0x15d   :  { %616 = vmatpush.msrb.mxu0 %v1495_v55  ;;  %655 = vmatpush.msrb.mxu2 %v1414_v31 }
 0x15e   :  { %637 = vmatpush.msrb.mxu1 %v1351_v13 }
 0x15f   :  { %617 = vmatpush.msrb.mxu0 %v1503_v58  ;;  %656 = vmatpush.msrb.mxu2 %v1417_v32 }
 0x160   :  { %638 = vmatpush.msrb.mxu1 %v1354_v15 }
 0x161   :  { %618 = vmatpush.msrb.mxu0 %v1509_v59  ;;  %657 = vmatpush.msrb.mxu2 %v1420_v33 }
 0x162   :  { %639 = vmatpush.msrb.mxu1 %v1359_v16 }
 0x163   :  { %619 = vmatpush.msrb.mxu0 %v1514_v61  ;;  %658 = vmatpush.msrb.mxu2 %v1423_v34 }
 0x164   :  { %640 = vmatpush.msrb.mxu1 %v1362_v17 }
 0x165   :  { %620 = vmatpush.msrb.mxu0 %v1519_v62  ;;  %659 = vmatpush.msrb.mxu2 %v1426_v35 }
 0x166   :  { %641 = vmatpush.msrb.mxu1 %v1365_v18 }
 0x167   :  { %621 = vmatpush.msrb.mxu0 %v1526_v0  ;;  %660 = vmatpush.msrb.mxu2 %v1432_v37 }
 0x168   :  { %642 = vmatpush.msrb.mxu1 %v1368_v20 }
 0x169   :  { %622 = vmatpush.msrb.mxu0 %v1531_v1  ;;  %661 = vmatpush.msrb.mxu2 %v1436_v38 }
 0x16a   :  { %643 = vmatpush.msrb.mxu1 %v1373_v21 }
 0x16b   :  { %623 = vmatpush.msrb.mxu0 %v1536_v2  ;;  %662 = vmatpush.msrb.mxu2 %v1440_v40 }
 0x16c   :  { %644 = vmatpush.msrb.mxu1 %v1376_v22 }
 0x16d   :  { %624 = vmatpush.msrb.mxu0 %v1546_v4  ;;  %663 = vmatpush.msrb.mxu2 %v1446_v41 }
 0x16e   :  { %645 = vmatpush.msrb.mxu1 %v1379_v23 }
 0x16f   :  { %625 = vmatpush.msrb.mxu0 %v1551_v5  ;;  %664 = vmatpush.msrb.mxu2 %v1463_v46 }
 0x170   :  { %646 = vmatpush.msrb.mxu1 %v1382_v25 }
 0x171   :  { %665 = vmatpush.msrb.mxu2 %v1471_v48 }
 0x173   :  { %666 = vmatpush.msrb.mxu2 %v1479_v50 }
 0x175   :  { %667 = vmatpush.msrb.mxu2 %v1493_v54 }
 0x177   :  { %668 = vmatpush.msrb.mxu2 %v1501_v56 }
 0x1cd   :  { %v459_v44 = vpop.f32.mrf.mxu0  ;;  %v481_v9 = vpop.f32.mrf.mxu1 }
 0x1ce   :  { %v462_v52 = vadd.f32 %v459_v44, %v224_v36  ;;  %v482_v14 = vadd.f32 %v1661_v60, %v481_v9  ;;  %v250_v36 = vadd.f32 %v1543_v3, %v1647_v27 }
 0x1d0   :  { %1110 = vtanh.f32 %v462_v52 }
 0x1d6   :  { %v1111_v57 = vpop.eup %1110 }
 0x1d7   :  { %521 = vmatmul.f32.vlgmr.msrb.gmra.mxu3 %v1111_v57  ;;  %543 = vmatmul.f32.vlgmr.msra.gmra.mxu0 %v1111_v57 }
 0x1d8   :  { %673 = vmatpush.msrb.mxu3 %v1453_v42  ;;  %694 = vmatpush.msra.mxu0 %v1332_v6 }
 0x1da   :  { %674 = vmatpush.msrb.mxu3 %v1458_v45  ;;  %695 = vmatpush.msra.mxu0 %v1334_v7 }
 0x1db   :  { %v501_v19 = vpop.f32.mrf.mxu2 }
 0x1dc   :  { %v502_v24 = vadd.f32 %v501_v19, %v482_v14  ;;  %675 = vmatpush.msrb.mxu3 %v1465_v47  ;;  %696 = vmatpush.msra.mxu0 %v1337_v8 }
 0x1de   :  { %1112 = vtanh.f32 %v502_v24  ;;  %676 = vmatpush.msrb.mxu3 %v1473_v49  ;;  %697 = vmatpush.msra.mxu0 %v1340_v10 }
 0x1e0   :  { %677 = vmatpush.msrb.mxu3 %v1481_v51  ;;  %698 = vmatpush.msra.mxu0 %v1345_v11 }
 0x1e2   :  { %678 = vmatpush.msrb.mxu3 %v1487_v53  ;;  %699 = vmatpush.msra.mxu0 %v1348_v12 }
 0x1e4   :  { %v1730_v28 = vpop.eup %1112  ;;  %679 = vmatpush.msrb.mxu3 %v1495_v55  ;;  %700 = vmatpush.msra.mxu0 %v1351_v13 }
 0x1e5   :  { %563 = vmatmul.f32.vlgmr.msra.gmra.mxu1 %v1730_v28 }
 0x1e6   :  { %680 = vmatpush.msrb.mxu3 %v1503_v58  ;;  %716 = vmatpush.msra.mxu1 %v1408_v29 }
 0x1e7   :  { %701 = vmatpush.msra.mxu0 %v1354_v15 }
 0x1e8   :  { %681 = vmatpush.msrb.mxu3 %v1509_v59  ;;  %717 = vmatpush.msra.mxu1 %v1411_v30 }
 0x1e9   :  { %702 = vmatpush.msra.mxu0 %v1359_v16 }
 0x1ea   :  { %682 = vmatpush.msrb.mxu3 %v1514_v61  ;;  %718 = vmatpush.msra.mxu1 %v1414_v31 }
 0x1eb   :  { %703 = vmatpush.msra.mxu0 %v1362_v17 }
 0x1ec   :  { %683 = vmatpush.msrb.mxu3 %v1519_v62  ;;  %719 = vmatpush.msra.mxu1 %v1417_v32 }
 0x1ed   :  { %704 = vmatpush.msra.mxu0 %v1365_v18 }
 0x1ee   :  { %684 = vmatpush.msrb.mxu3 %v1526_v0  ;;  %720 = vmatpush.msra.mxu1 %v1420_v33 }
 0x1ef   :  { %705 = vmatpush.msra.mxu0 %v1368_v20 }
 0x1f0   :  { %685 = vmatpush.msrb.mxu3 %v1531_v1  ;;  %721 = vmatpush.msra.mxu1 %v1423_v34 }
 0x1f1   :  { %706 = vmatpush.msra.mxu0 %v1373_v21 }
 0x1f2   :  { %686 = vmatpush.msrb.mxu3 %v1536_v2  ;;  %722 = vmatpush.msra.mxu1 %v1426_v35 }
 0x1f3   :  { %707 = vmatpush.msra.mxu0 %v1376_v22 }
 0x1f4   :  { %687 = vmatpush.msrb.mxu3 %v1546_v4  ;;  %723 = vmatpush.msra.mxu1 %v1432_v37 }
 0x1f5   :  { %708 = vmatpush.msra.mxu0 %v1379_v23 }
 0x1f6   :  { %688 = vmatpush.msrb.mxu3 %v1551_v5  ;;  %724 = vmatpush.msra.mxu1 %v1436_v38 }
 0x1f7   :  { %709 = vmatpush.msra.mxu0 %v1382_v25 }
 0x1f8   :  { %725 = vmatpush.msra.mxu1 %v1440_v40 }
 0x1fa   :  { %726 = vmatpush.msra.mxu1 %v1446_v41 }
 0x1fc   :  { %727 = vmatpush.msra.mxu1 %v1463_v46 }
 0x1fe   :  { %728 = vmatpush.msra.mxu1 %v1471_v48 }
 0x200   :  { %729 = vmatpush.msra.mxu1 %v1479_v50 }
 0x202   :  { %730 = vmatpush.msra.mxu1 %v1493_v54 }
 0x204   :  { %731 = vmatpush.msra.mxu1 %v1501_v56 }
 0x254   :  { %v544_v57 = vpop.f32.mrf.mxu0 }
 0x255   :  { %v545_v9 = vadd.f32 %v1661_v60, %v544_v57 }
 0x25a   :  { %v522_v44 = vpop.f32.mrf.mxu3 }
 0x25b   :  { %v525_v52 = vadd.f32 %v522_v44, %v250_v36 }
 0x25d   :  { %1114 = vtanh.f32 %v525_v52 }
 0x262   :  { %v564_v14 = vpop.f32.mrf.mxu1 }
 0x263   :  { %v1115_v19 = vpop.eup %1114  ;;  %v565_v24 = vadd.f32 %v564_v14, %v545_v9 }
 0x264   :  { %584 = vmatmul.f32.vlgmr.msra.gmra.mxu2 %v1115_v19  ;;  %606 = vmatmul.f32.vlgmr.msra.gmra.mxu3 %v1115_v19 }
 0x265   :  { %1116 = vtanh.f32 %v565_v24  ;;  %736 = vmatpush.msra.mxu2 %v1453_v42  ;;  %757 = vmatpush.msra.mxu3 %v1332_v6  ;;  %v274_v6 = vadd.f32 %v1543_v3, %v1524_v63 }
 0x267   :  { %737 = vmatpush.msra.mxu2 %v1458_v45  ;;  %758 = vmatpush.msra.mxu3 %v1334_v7 }
 0x269   :  { %738 = vmatpush.msra.mxu2 %v1465_v47  ;;  %759 = vmatpush.msra.mxu3 %v1337_v8 }
 0x26b   :  { %v1778_v27 = vpop.eup %1116  ;;  %739 = vmatpush.msra.mxu2 %v1473_v49  ;;  %760 = vmatpush.msra.mxu3 %v1340_v10 }
 0x26c   :  { %626 = vmatmul.f32.vlgmr.msrb.gmra.mxu0 %v1778_v27 }
 0x26d   :  { %740 = vmatpush.msra.mxu2 %v1481_v51  ;;  %779 = vmatpush.msrb.mxu0 %v1408_v29 }
 0x26e   :  { %761 = vmatpush.msra.mxu3 %v1345_v11 }
 0x26f   :  { %741 = vmatpush.msra.mxu2 %v1487_v53  ;;  %780 = vmatpush.msrb.mxu0 %v1411_v30 }
 0x270   :  { %762 = vmatpush.msra.mxu3 %v1348_v12 }
 0x271   :  { %742 = vmatpush.msra.mxu2 %v1495_v55  ;;  %781 = vmatpush.msrb.mxu0 %v1414_v31 }
 0x272   :  { %763 = vmatpush.msra.mxu3 %v1351_v13 }
 0x273   :  { %743 = vmatpush.msra.mxu2 %v1503_v58  ;;  %782 = vmatpush.msrb.mxu0 %v1417_v32 }
 0x274   :  { %764 = vmatpush.msra.mxu3 %v1354_v15 }
 0x275   :  { %744 = vmatpush.msra.mxu2 %v1509_v59  ;;  %783 = vmatpush.msrb.mxu0 %v1420_v33 }
 0x276   :  { %765 = vmatpush.msra.mxu3 %v1359_v16 }
 0x277   :  { %745 = vmatpush.msra.mxu2 %v1514_v61  ;;  %784 = vmatpush.msrb.mxu0 %v1423_v34 }
 0x278   :  { %766 = vmatpush.msra.mxu3 %v1362_v17  ;;  %v2082_v17 = vld [vmem:[#allocation12_spill] sm:$0xff] }
 0x279   :  { %746 = vmatpush.msra.mxu2 %v1519_v62  ;;  %785 = vmatpush.msrb.mxu0 %v1426_v35 }
 0x27a   :  { %767 = vmatpush.msra.mxu3 %v1365_v18  ;;  %v300_v18 = vadd.f32 %v1543_v3, %v2082_v17 }
 0x27b   :  { %747 = vmatpush.msra.mxu2 %v1526_v0  ;;  %786 = vmatpush.msrb.mxu0 %v1432_v37 }
 0x27c   :  { %768 = vmatpush.msra.mxu3 %v1368_v20 }
 0x27d   :  { %748 = vmatpush.msra.mxu2 %v1531_v1  ;;  %787 = vmatpush.msrb.mxu0 %v1436_v38 }
 0x27e   :  { %769 = vmatpush.msra.mxu3 %v1373_v21 }
 0x27f   :  { %749 = vmatpush.msra.mxu2 %v1536_v2  ;;  %788 = vmatpush.msrb.mxu0 %v1440_v40 }
 0x280   :  { %770 = vmatpush.msra.mxu3 %v1376_v22 }
 0x281   :  { %750 = vmatpush.msra.mxu2 %v1546_v4  ;;  %789 = vmatpush.msrb.mxu0 %v1446_v41 }
 0x282   :  { %771 = vmatpush.msra.mxu3 %v1379_v23 }
 0x283   :  { %751 = vmatpush.msra.mxu2 %v1551_v5  ;;  %790 = vmatpush.msrb.mxu0 %v1463_v46 }
 0x284   :  { %772 = vmatpush.msra.mxu3 %v1382_v25 }
 0x285   :  { %791 = vmatpush.msrb.mxu0 %v1471_v48 }
 0x287   :  { %792 = vmatpush.msrb.mxu0 %v1479_v50 }
 0x289   :  { %793 = vmatpush.msrb.mxu0 %v1493_v54 }
 0x28b   :  { %794 = vmatpush.msrb.mxu0 %v1501_v56 }
 0x2e7   :  { %v585_v7 = vpop.f32.mrf.mxu2  ;;  %v607_v8 = vpop.f32.mrf.mxu3 }
 0x2e8   :  { %v588_v10 = vadd.f32 %v585_v7, %v274_v6  ;;  %v608_v11 = vadd.f32 %v1661_v60, %v607_v8 }
 0x2e9   :  { %v627_v12 = vpop.f32.mrf.mxu0 }
 0x2ea   :  { %1118 = vtanh.f32 %v588_v10  ;;  %v628_v13 = vadd.f32 %v627_v12, %v608_v11  ;;  %v1103_v10 = vld [vmem:[%s2079_s7] ss:$0 sm:$0xff] }
 0x2ec   :  { %1120 = vtanh.f32 %v628_v13 }
 0x2f0   :  { %v1119_v15 = vpop.eup %1118 }
 0x2f1   :  { %647 = vmatmul.f32.vlgmr.msrb.gmra.mxu1 %v1119_v15  ;;  %669 = vmatmul.f32.vlgmr.msrb.gmra.mxu2 %v1119_v15 }
 0x2f2   :  { %v1826_v16 = vpop.eup %1120  ;;  %799 = vmatpush.msrb.mxu1 %v1453_v42  ;;  %820 = vmatpush.msrb.mxu2 %v1408_v29  ;;  %v1880_v29 = vld [vmem:[#allocation7 + $0x78] sm:$0xff] }
 0x2f3   :  { %689 = vmatmul.f32.vlgmr.msrb.gmra.mxu3 %v1826_v16 }
 0x2f4   :  { %800 = vmatpush.msrb.mxu1 %v1458_v45  ;;  %821 = vmatpush.msrb.mxu2 %v1411_v30 }
 0x2f5   :  { %840 = vmatpush.msrb.mxu3 %v1453_v42  ;;  %v1915_v42 = vld [vmem:[#allocation7 + $0x38] sm:$0xff] }
 0x2f6   :  { %801 = vmatpush.msrb.mxu1 %v1465_v47  ;;  %822 = vmatpush.msrb.mxu2 %v1414_v31 }
 0x2f7   :  { %841 = vmatpush.msrb.mxu3 %v1458_v45  ;;  %v1920_v45 = vld [vmem:[#allocation7 + $0x30] sm:$0xff] }
 0x2f8   :  { %802 = vmatpush.msrb.mxu1 %v1473_v49  ;;  %823 = vmatpush.msrb.mxu2 %v1417_v32  ;;  %v1882_v32 = vld [vmem:[#allocation7 + $0x70] sm:$0xff] }
 0x2f9   :  { %842 = vmatpush.msrb.mxu3 %v1465_v47  ;;  %v1938_v47 = vld [vmem:[#allocation7 + $0x20] sm:$0xff] }
 0x2fa   :  { %803 = vmatpush.msrb.mxu1 %v1481_v51  ;;  %824 = vmatpush.msrb.mxu2 %v1420_v33  ;;  %v1886_v33 = vld [vmem:[#allocation7 + $0x68] sm:$0xff] }
 0x2fb   :  { %843 = vmatpush.msrb.mxu3 %v1473_v49  ;;  %v1946_v49 = vld [vmem:[#allocation7 + $0x10] sm:$0xff] }
 0x2fc   :  { %804 = vmatpush.msrb.mxu1 %v1487_v53  ;;  %825 = vmatpush.msrb.mxu2 %v1423_v34  ;;  %v1890_v34 = vld [vmem:[#allocation7 + $0x60] sm:$0xff] }
 0x2fd   :  { %844 = vmatpush.msrb.mxu3 %v1481_v51  ;;  %v1954_v51 = vld [vmem:[#allocation7] sm:$0xff] }
 0x2fe   :  { %805 = vmatpush.msrb.mxu1 %v1495_v55  ;;  %826 = vmatpush.msrb.mxu2 %v1426_v35  ;;  %v1894_v35 = vld [vmem:[#allocation7 + $0x58] sm:$0xff] }
 0x2ff   :  { %845 = vmatpush.msrb.mxu3 %v1487_v53  ;;  %v326_v53 = vadd.f32 %v1543_v3, %v1655_v43 }
 0x300   :  { %806 = vmatpush.msrb.mxu1 %v1503_v58  ;;  %827 = vmatpush.msrb.mxu2 %v1432_v37 }
 0x301   :  { %846 = vmatpush.msrb.mxu3 %v1495_v55 }
 0x302   :  { %807 = vmatpush.msrb.mxu1 %v1509_v59  ;;  %828 = vmatpush.msrb.mxu2 %v1436_v38  ;;  %v1901_v38 = vld [vmem:[#allocation7 + $0x50] sm:$0xff] }
 0x303   :  { %847 = vmatpush.msrb.mxu3 %v1503_v58 }
 0x304   :  { %808 = vmatpush.msrb.mxu1 %v1514_v61  ;;  %829 = vmatpush.msrb.mxu2 %v1440_v40  ;;  %v1905_v40 = vld [vmem:[#allocation7 + $0x48] sm:$0xff] }
 0x305   :  { %848 = vmatpush.msrb.mxu3 %v1509_v59 }
 0x306   :  { %809 = vmatpush.msrb.mxu1 %v1519_v62  ;;  %830 = vmatpush.msrb.mxu2 %v1446_v41  ;;  %v1910_v41 = vld [vmem:[#allocation7 + $0x40] sm:$0xff] }
 0x307   :  { %849 = vmatpush.msrb.mxu3 %v1514_v61 }
 0x308   :  { %810 = vmatpush.msrb.mxu1 %v1526_v0  ;;  %831 = vmatpush.msrb.mxu2 %v1463_v46  ;;  %v1925_v46 = vld [vmem:[#allocation7 + $0x28] sm:$0xff] }
 0x309   :  { %850 = vmatpush.msrb.mxu3 %v1519_v62 }
 0x30a   :  { %811 = vmatpush.msrb.mxu1 %v1531_v1  ;;  %832 = vmatpush.msrb.mxu2 %v1471_v48  ;;  %v1942_v48 = vld [vmem:[#allocation7 + $0x18] sm:$0xff] }
 0x30b   :  { %851 = vmatpush.msrb.mxu3 %v1526_v0 }
 0x30c   :  { %812 = vmatpush.msrb.mxu1 %v1536_v2  ;;  %833 = vmatpush.msrb.mxu2 %v1479_v50  ;;  %v1949_v50 = vld [vmem:[#allocation7 + $0x8] sm:$0xff] }
 0x30d   :  { %852 = vmatpush.msrb.mxu3 %v1531_v1 }
 0x30e   :  { %813 = vmatpush.msrb.mxu1 %v1546_v4  ;;  %834 = vmatpush.msrb.mxu2 %v1493_v54 }
 0x30f   :  { %853 = vmatpush.msrb.mxu3 %v1536_v2 }
 0x310   :  { %814 = vmatpush.msrb.mxu1 %v1551_v5  ;;  %835 = vmatpush.msrb.mxu2 %v1501_v56 }
 0x311   :  { %854 = vmatpush.msrb.mxu3 %v1546_v4  ;;  %v1152_v4 = vld [vmem:[%s2075_s3] ss:$0 sm:$0xff] }
 0x313   :  { %855 = vmatpush.msrb.mxu3 %v1551_v5  ;;  %v352_v5 = vadd.f32 %v1152_v4, %v1653_v39 }
 0x36e   :  { %v648_v20 = vpop.f32.mrf.mxu1 }
 0x36f   :  { %v651_v21 = vadd.f32 %v648_v20, %v300_v18 }
 0x371   :  { %1122 = vtanh.f32 %v651_v21 }
 0x374   :  { %v670_v22 = vpop.f32.mrf.mxu2 }
 0x375   :  { %v671_v23 = vadd.f32 %v1661_v60, %v670_v22 }
 0x376   :  { %v690_v25 = vpop.f32.mrf.mxu3 }
 0x377   :  { %v1123_v30 = vpop.eup %1122  ;;  %v691_v31 = vadd.f32 %v690_v25, %v671_v23 }
 0x378   :  { %710 = vmatmul.f32.vlgmr.msra.gmra.mxu0 %v1123_v30  ;;  %732 = vmatmul.f32.vlgmr.msra.gmra.mxu1 %v1123_v30 }
 0x379   :  { %1124 = vtanh.f32 %v691_v31  ;;  %882 = vmatpush.msra.mxu0 %v1880_v29  ;;  %903 = vmatpush.msra.mxu1 %v1880_v29 }
 0x37b   :  { %883 = vmatpush.msra.mxu0 %v1882_v32  ;;  %904 = vmatpush.msra.mxu1 %v1882_v32 }
 0x37d   :  { %884 = vmatpush.msra.mxu0 %v1886_v33  ;;  %905 = vmatpush.msra.mxu1 %v1886_v33 }
 0x37f   :  { %v1896_v37 = vpop.eup %1124  ;;  %885 = vmatpush.msra.mxu0 %v1890_v34  ;;  %906 = vmatpush.msra.mxu1 %v1890_v34 }
 0x380   :  { %752 = vmatmul.f32.vlgmr.msra.gmra.mxu2 %v1896_v37 }
 0x381   :  { %886 = vmatpush.msra.mxu0 %v1894_v35  ;;  %907 = vmatpush.msra.mxu1 %v1894_v35 }
 0x382   :  { %924 = vmatpush.msra.mxu2 %v1880_v29 }
 0x383   :  { %887 = vmatpush.msra.mxu0 %v1901_v38  ;;  %908 = vmatpush.msra.mxu1 %v1901_v38 }
 0x384   :  { %925 = vmatpush.msra.mxu2 %v1882_v32 }
 0x385   :  { %888 = vmatpush.msra.mxu0 %v1905_v40  ;;  %909 = vmatpush.msra.mxu1 %v1905_v40 }
 0x386   :  { %926 = vmatpush.msra.mxu2 %v1886_v33 }
 0x387   :  { %889 = vmatpush.msra.mxu0 %v1910_v41  ;;  %910 = vmatpush.msra.mxu1 %v1910_v41 }
 0x388   :  { %927 = vmatpush.msra.mxu2 %v1890_v34 }
 0x389   :  { %890 = vmatpush.msra.mxu0 %v1915_v42  ;;  %911 = vmatpush.msra.mxu1 %v1915_v42 }
 0x38a   :  { %928 = vmatpush.msra.mxu2 %v1894_v35 }
 0x38b   :  { %891 = vmatpush.msra.mxu0 %v1920_v45  ;;  %912 = vmatpush.msra.mxu1 %v1920_v45 }
 0x38c   :  { %929 = vmatpush.msra.mxu2 %v1901_v38 }
 0x38d   :  { %892 = vmatpush.msra.mxu0 %v1925_v46  ;;  %913 = vmatpush.msra.mxu1 %v1925_v46 }
 0x38e   :  { %930 = vmatpush.msra.mxu2 %v1905_v40 }
 0x38f   :  { %893 = vmatpush.msra.mxu0 %v1938_v47  ;;  %914 = vmatpush.msra.mxu1 %v1938_v47 }
 0x390   :  { %931 = vmatpush.msra.mxu2 %v1910_v41 }
 0x391   :  { %894 = vmatpush.msra.mxu0 %v1942_v48  ;;  %915 = vmatpush.msra.mxu1 %v1942_v48 }
 0x392   :  { %932 = vmatpush.msra.mxu2 %v1915_v42 }
 0x393   :  { %895 = vmatpush.msra.mxu0 %v1946_v49  ;;  %916 = vmatpush.msra.mxu1 %v1946_v49 }
 0x394   :  { %933 = vmatpush.msra.mxu2 %v1920_v45 }
 0x395   :  { %896 = vmatpush.msra.mxu0 %v1949_v50  ;;  %917 = vmatpush.msra.mxu1 %v1949_v50 }
 0x396   :  { %934 = vmatpush.msra.mxu2 %v1925_v46 }
 0x397   :  { %897 = vmatpush.msra.mxu0 %v1954_v51  ;;  %918 = vmatpush.msra.mxu1 %v1954_v51 }
 0x398   :  { %935 = vmatpush.msra.mxu2 %v1938_v47 }
 0x39a   :  { %936 = vmatpush.msra.mxu2 %v1942_v48 }
 0x39c   :  { %937 = vmatpush.msra.mxu2 %v1946_v49 }
 0x39e   :  { %938 = vmatpush.msra.mxu2 %v1949_v50 }
 0x3a0   :  { %939 = vmatpush.msra.mxu2 %v1954_v51 }
 0x3f5   :  { %v711_v54 = vpop.f32.mrf.mxu0  ;;  %v733_v58 = vpop.f32.mrf.mxu1 }
 0x3f6   :  { %v714_v55 = vadd.f32 %v711_v54, %v326_v53  ;;  %v734_v59 = vadd.f32 %v1661_v60, %v733_v58 }
 0x3f8   :  { %1126 = vtanh.f32 %v714_v55 }
 0x3f9   :  { %1128 = vtanh.f32 %v1670_v26 }
 0x3fe   :  { %v1127_v56 = vpop.eup %1126 }
 0x3ff   :  { %773 = vmatmul.f32.vlgmr.msra.gmra.mxu3 %v1127_v56  ;;  %795 = vmatmul.f32.vlgmr.msrb.gmra.mxu0 %v1127_v56  ;;  %v1129_v63 = vpop.eup %1128 }
 0x400   :  { %966 = vmatpush.msrb.mxu0 %v1880_v29  ;;  %945 = vmatpush.msra.mxu3 %v1880_v29 }
 0x402   :  { %967 = vmatpush.msrb.mxu0 %v1882_v32  ;;  %946 = vmatpush.msra.mxu3 %v1882_v32 }
 0x403   :  { %v753_v61 = vpop.f32.mrf.mxu2 }
 0x404   :  { %v754_v62 = vadd.f32 %v753_v61, %v734_v59  ;;  %968 = vmatpush.msrb.mxu0 %v1886_v33  ;;  %947 = vmatpush.msra.mxu3 %v1886_v33 }
 0x406   :  { %1130 = vtanh.f32 %v754_v62  ;;  %969 = vmatpush.msrb.mxu0 %v1890_v34  ;;  %948 = vmatpush.msra.mxu3 %v1890_v34 }
 0x407   :  { %898 = vmatmul.f32.vlgmr.msra.gmra.mxu0 %v1129_v63  ;;  %1132 = vtanh.f32 %v1730_v28 }
 0x408   :  { %970 = vmatpush.msrb.mxu0 %v1894_v35  ;;  %949 = vmatpush.msra.mxu3 %v1894_v35  ;;  %1134 = vtanh.f32 %v1896_v37 }
 0x40a   :  { %971 = vmatpush.msrb.mxu0 %v1901_v38  ;;  %950 = vmatpush.msra.mxu3 %v1901_v38 }
 0x40c   :  { %v1131_v0 = vpop.eup %1130  ;;  %972 = vmatpush.msrb.mxu0 %v1905_v40  ;;  %951 = vmatpush.msra.mxu3 %v1905_v40 }
 0x40d   :  { %815 = vmatmul.f32.vlgmr.msrb.gmra.mxu1 %v1131_v0  ;;  %v1133_v1 = vpop.eup %1132  ;;  %1136 = vtanh.f32 %v1131_v0 }
 0x40e   :  { %973 = vmatpush.msrb.mxu0 %v1910_v41  ;;  %987 = vmatpush.msrb.mxu1 %v1880_v29  ;;  %v1135_v2 = vpop.eup %1134 }
 0x40f   :  { %952 = vmatpush.msra.mxu3 %v1910_v41 }
 0x410   :  { %974 = vmatpush.msrb.mxu0 %v1915_v42  ;;  %988 = vmatpush.msrb.mxu1 %v1882_v32 }
 0x411   :  { %953 = vmatpush.msra.mxu3 %v1915_v42 }
 0x412   :  { %975 = vmatpush.msrb.mxu0 %v1920_v45  ;;  %989 = vmatpush.msrb.mxu1 %v1886_v33 }
 0x413   :  { %954 = vmatpush.msra.mxu3 %v1920_v45  ;;  %v1137_v3 = vpop.eup %1136 }
 0x414   :  { %976 = vmatpush.msrb.mxu0 %v1925_v46  ;;  %990 = vmatpush.msrb.mxu1 %v1890_v34 }
 0x415   :  { %919 = vmatmul.f32.vlgmr.msra.gmra.mxu1 %v1133_v1  ;;  %955 = vmatpush.msra.mxu3 %v1925_v46 }
 0x416   :  { %977 = vmatpush.msrb.mxu0 %v1938_v47  ;;  %991 = vmatpush.msrb.mxu1 %v1894_v35 }
 0x417   :  { %956 = vmatpush.msra.mxu3 %v1938_v47 }
 0x418   :  { %978 = vmatpush.msrb.mxu0 %v1942_v48  ;;  %992 = vmatpush.msrb.mxu1 %v1901_v38 }
 0x419   :  { %957 = vmatpush.msra.mxu3 %v1942_v48 }
 0x41a   :  { %979 = vmatpush.msrb.mxu0 %v1946_v49  ;;  %993 = vmatpush.msrb.mxu1 %v1905_v40 }
 0x41b   :  { %958 = vmatpush.msra.mxu3 %v1946_v49 }
 0x41c   :  { %980 = vmatpush.msrb.mxu0 %v1949_v50  ;;  %994 = vmatpush.msrb.mxu1 %v1910_v41 }
 0x41d   :  { %959 = vmatpush.msra.mxu3 %v1949_v50 }
 0x41e   :  { %981 = vmatpush.msrb.mxu0 %v1954_v51  ;;  %995 = vmatpush.msrb.mxu1 %v1915_v42 }
 0x41f   :  { %982 = vmatmul.f32.vlgmr.msrb.gmra.mxu0 %v1135_v2  ;;  %960 = vmatpush.msra.mxu3 %v1954_v51 }
 0x420   :  { %996 = vmatpush.msrb.mxu1 %v1920_v45 }
 0x422   :  { %997 = vmatpush.msrb.mxu1 %v1925_v46 }
 0x424   :  { %998 = vmatpush.msrb.mxu1 %v1938_v47 }
 0x426   :  { %999 = vmatpush.msrb.mxu1 %v1942_v48 }
 0x428   :  { %1000 = vmatpush.msrb.mxu1 %v1946_v49 }
 0x42a   :  { %1001 = vmatpush.msrb.mxu1 %v1949_v50 }
 0x42c   :  { %1002 = vmatpush.msrb.mxu1 %v1954_v51 }
 0x42d   :  { %1003 = vmatmul.f32.vlgmr.msrb.gmra.mxu1 %v1137_v3 }
 0x47c   :  { %v796_v28 = vpop.f32.mrf.mxu0 }
 0x47d   :  { %v797_v36 = vadd.f32 %v1661_v60, %v796_v28 }
 0x482   :  { %v774_v43 = vpop.f32.mrf.mxu3 }
 0x483   :  { %v777_v26 = vadd.f32 %v774_v43, %v352_v5 }
 0x484   :  { %v899_v15 = vpop.f32.mrf.mxu0 }
 0x485   :  { %1138 = vtanh.f32 %v777_v26 }
 0x486   :  { %1140 = vtanh.f32 %v1778_v27 }
 0x48a   :  { %v816_v44 = vpop.f32.mrf.mxu1 }
 0x48b   :  { %v1139_v52 = vpop.eup %1138  ;;  %v817_v57 = vadd.f32 %v816_v44, %v797_v36 }
 0x48c   :  { %836 = vmatmul.f32.vlgmr.msrb.gmra.mxu2 %v1139_v52  ;;  %v1141_v39 = vpop.eup %1140 }
 0x48d   :  { %1142 = vtanh.f32 %v817_v57  ;;  %1008 = vmatpush.msrb.mxu2 %v1880_v29 }
 0x48e   :  { %1144 = vtanh.f32 %v1826_v16 }
 0x48f   :  { %1009 = vmatpush.msrb.mxu2 %v1882_v32 }
 0x491   :  { %1010 = vmatpush.msrb.mxu2 %v1886_v33 }
 0x492   :  { %v920_v8 = vpop.f32.mrf.mxu1 }
 0x493   :  { %v1143_v9 = vpop.eup %1142  ;;  %1011 = vmatpush.msrb.mxu2 %v1890_v34  ;;  %v921_v12 = vadd.f32 %v1103_v10, %v920_v8 }
 0x494   :  { %856 = vmatmul.f32.vlgmr.msrb.gmra.mxu3 %v1143_v9  ;;  %940 = vmatmul.f32.vlgmr.msra.gmra.mxu2 %v1141_v39  ;;  %v1145_v14 = vpop.eup %1144  ;;  %1146 = vtanh.f32 %v1143_v9 }
 0x495   :  { %1012 = vmatpush.msrb.mxu2 %v1894_v35  ;;  %1029 = vmatpush.msrb.mxu3 %v1880_v29  ;;  %v1057_v18 = vrot.slane %v921_v12, 6 }
 0x497   :  { %1013 = vmatpush.msrb.mxu2 %v1901_v38  ;;  %1030 = vmatpush.msrb.mxu3 %v1882_v32 }
 0x499   :  { %1014 = vmatpush.msrb.mxu2 %v1905_v40  ;;  %1031 = vmatpush.msrb.mxu3 %v1886_v33 }
 0x49a   :  { %v1147_v19 = vpop.eup %1146 }
 0x49b   :  { %1015 = vmatpush.msrb.mxu2 %v1910_v41  ;;  %1032 = vmatpush.msrb.mxu3 %v1890_v34 }
 0x49c   :  { %961 = vmatmul.f32.vlgmr.msra.gmra.mxu3 %v1145_v14 }
 0x49d   :  { %1016 = vmatpush.msrb.mxu2 %v1915_v42  ;;  %1033 = vmatpush.msrb.mxu3 %v1894_v35  ;;  %v983_v35 = vpop.f32.mrf.mxu0 }
 0x49f   :  { %1017 = vmatpush.msrb.mxu2 %v1920_v45  ;;  %1034 = vmatpush.msrb.mxu3 %v1901_v38 }
 0x4a1   :  { %1018 = vmatpush.msrb.mxu2 %v1925_v46  ;;  %1035 = vmatpush.msrb.mxu3 %v1905_v40 }
 0x4a3   :  { %1019 = vmatpush.msrb.mxu2 %v1938_v47  ;;  %1036 = vmatpush.msrb.mxu3 %v1910_v41  ;;  %v984_v41 = vadd.f32 %v1103_v10, %v983_v35 }
 0x4a5   :  { %1020 = vmatpush.msrb.mxu2 %v1942_v48  ;;  %1037 = vmatpush.msrb.mxu3 %v1915_v42 }
 0x4a7   :  { %1021 = vmatpush.msrb.mxu2 %v1946_v49  ;;  %1038 = vmatpush.msrb.mxu3 %v1920_v45 }
 0x4a9   :  { %1022 = vmatpush.msrb.mxu2 %v1949_v50  ;;  %1039 = vmatpush.msrb.mxu3 %v1925_v46 }
 0x4aa   :  { %v1004_v31 = vpop.f32.mrf.mxu1 }
 0x4ab   :  { %1023 = vmatpush.msrb.mxu2 %v1954_v51  ;;  %1040 = vmatpush.msrb.mxu3 %v1938_v47  ;;  %v1005_v33 = vadd.f32 %v1103_v10, %v1004_v31 }
 0x4ac   :  { %1024 = vmatmul.f32.vlgmr.msrb.gmra.mxu2 %v1147_v19 }
 0x4ad   :  { %1041 = vmatpush.msrb.mxu3 %v1942_v48  ;;  %v1060_v38 = vrot.slane %v1005_v33, 6 }
 0x4af   :  { %1042 = vmatpush.msrb.mxu3 %v1946_v49  ;;  %v1069_v46 = vsel %vm1063_vm1, %v984_v41, %v1060_v38 }
 0x4b1   :  { %1043 = vmatpush.msrb.mxu3 %v1949_v50 }
 0x4b3   :  { %1044 = vmatpush.msrb.mxu3 %v1954_v51 }
 0x50f   :  { %v837_v24 = vpop.f32.mrf.mxu2 }
 0x510   :  { %v838_v27 = vadd.f32 %v1661_v60, %v837_v24  ;;  %v900_v60 = vadd.f32 %v1103_v10, %v899_v15 }
 0x512   :  { %v1064_v23 = vsel %vm1063_vm1, %v900_v60, %v1057_v18 }
 0x517   :  { %v857_v6 = vpop.f32.mrf.mxu3  ;;  %v941_v11 = vpop.f32.mrf.mxu2 }
 0x518   :  { %v858_v7 = vadd.f32 %v857_v6, %v838_v27  ;;  %v942_v13 = vadd.f32 %v1103_v10, %v941_v11 }
 0x51a   :  { %1148 = vtanh.f32 %v858_v7  ;;  %v1058_v21 = vrot.slane %v942_v13, 4 }
 0x51f   :  { %v962_v16 = vpop.f32.mrf.mxu3 }
 0x520   :  { %v1149_v17 = vpop.eup %1148  ;;  %v963_v20 = vadd.f32 %v1103_v10, %v962_v16 }
 0x521   :  { %1150 = vtanh.f32 %v1149_v17 }
 0x522   :  { %v1059_v22 = vrot.slane %v963_v20, 2 }
 0x524   :  { %v1066_v25 = vsel %vm1065_vm2, %v1058_v21, %v1059_v22 }
 0x525   :  { %v1068_v29 = vsel %vm1067_vm3, %v1064_v23, %v1066_v25 }
 0x526   :  { %1074 = vst [vmem:[%s2080_s8] sm:$0xff] %v1068_v29 }
 0x527   :  { %v1151_v30 = vpop.eup %1150 }
 0x528   :  { %1045 = vmatmul.f32.vlgmr.msrb.gmra.mxu3 %v1151_v30 }
 0x52f   :  { %v1025_v32 = vpop.f32.mrf.mxu2 }
 0x530   :  { %v1026_v34 = vadd.f32 %v1103_v10, %v1025_v32 }
 0x532   :  { %v1061_v42 = vrot.slane %v1026_v34, 4 }
 0x5ab   :  { %v1046_v37 = vpop.f32.mrf.mxu3 }
 0x5ac   :  { %v1047_v40 = vadd.f32 %v1103_v10, %v1046_v37 }
 0x5ae   :  { %v1062_v45 = vrot.slane %v1047_v40, 2 }
 0x5b0   :  { %v1070_v47 = vsel %vm1065_vm2, %v1061_v42, %v1062_v45 }
 0x5b1   :  { %v1071_v48 = vsel %vm1067_vm3, %v1069_v46, %v1070_v47 }
 0x5b2   :  { %1075 = vst [vmem:[%s2080_s8 + $0x8] sm:$0xff] %v1071_v48 }
 0x5b3   :  { %1080 = vsyncpa [#allocation3], 1 }
 0x5b4   :  { %1081 = vsyncpa [#allocation5], 1 }
 0x5b5   :  { %1082 = vsyncpa [#allocation8], 1 }

</bundles_post_ra>
